<compile_context>
chip_gen: v7x
topology: tpu7x:2x2x1
jax: 0.10.0
libtpu: 0.0.40
codegen_flags: <defaults>
</compile_context>

<pallas_src>
import functools

import jax
import jax.numpy as jnp
import numpy as np
from jax.experimental import pallas as pl
from jax.experimental.pallas import tpu as pltpu


# ----------------------------- shared math helpers -----------------------------

def _layernorm(x, w, b, eps=1e-5):
    mu = jnp.mean(x, axis=-1, keepdims=True)
    var = jnp.mean((x - mu) ** 2, axis=-1, keepdims=True)
    return (x - mu) * jax.lax.rsqrt(var + eps) * w + b


def _gelu_exact(x):
    # PyTorch nn.GELU default (erf-based, exact)
    return 0.5 * x * (1.0 + jax.lax.erf(x * 0.7071067811865476))


# --------------------------------- Pallas kernel --------------------------------

def block_ca_kernel(x_ref, xcls_ref,
                    n1w_ref, n1b_ref,
                    qw_ref, kw_ref, vw_ref,
                    pw_ref, pb_ref,
                    lamb_ref,
                    seg_ref, segt_ref,
                    n2w_ref, n2b_ref,
                    f1w_ref, f1b_ref, f2w_ref, f2b_ref,
                    g1_ref, g2_ref,
                    out_ref,
                    *, qk_scale):
    bt, n, c = x_ref.shape          # batch tile, patch tokens, channels
    f32 = jnp.float32
    cdt = qw_ref.dtype              # matmul compute dtype (bf16 in prod, f32 in test)

    x = x_ref[...].astype(f32).reshape(bt * n, c)        # patch tokens, M-flattened
    xc = xcls_ref[...][:, 0, :].astype(f32)              # (bt, C) class token

    # norm1 (per-row, so cls / patch rows can be normalized separately) — f32 stats
    n1w = n1w_ref[...]
    n1b = n1b_ref[...]
    t_x = _layernorm(x, n1w, n1b).astype(cdt)            # (bt*N, C)
    t_c = _layernorm(xc, n1w, n1b).astype(cdt)           # (bt, C)

    # projections — bf16 operands, f32 accumulation; qk scale applied in f32
    q = jnp.dot(t_c, qw_ref[...], preferred_element_type=f32) * qk_scale      # (bt, C)
    k_c = jnp.dot(t_c, kw_ref[...], preferred_element_type=f32)               # (bt, C)
    v_c = jnp.dot(t_c, vw_ref[...], preferred_element_type=f32)               # (bt, C)
    k_x = jnp.dot(t_x, kw_ref[...], preferred_element_type=f32)               # (bt*N, C)
    v_x = jnp.dot(t_x, vw_ref[...], preferred_element_type=f32)               # (bt*N, C)

    seg = seg_ref[...]                                   # (C, H) head-reduce, cdt
    seg_t = segt_ref[...]                                # (H, C) head-expand, f32
    h = seg.shape[1]

    # per-head scores of the class query against every token
    qk_x = (q[:, None, :] * k_x.reshape(bt, n, c)).astype(cdt)                # (bt, N, C)
    s_x = jnp.dot(qk_x.reshape(bt * n, c), seg,
                  preferred_element_type=f32).reshape(bt, n, h)               # (bt, N, H)
    s_c = jnp.dot((q * k_c).astype(cdt), seg, preferred_element_type=f32)     # (bt, H)

    # numerically stable softmax over (cls + N patch tokens), per head — f32
    m = jnp.maximum(jnp.max(s_x, axis=1), s_c)                                # (bt, H)
    e_x = jnp.exp(s_x - m[:, None, :])                                        # (bt, N, H)
    e_c = jnp.exp(s_c - m)                                                    # (bt, H)
    den = e_c + jnp.sum(e_x, axis=1)                                          # (bt, H)

    # GFSA collapse: (a - I)@a == 0 for a row-broadcast stochastic row, hence
    # a_hat = (1 + beta) * a and the per-head output is (1 + beta) * (p @ v).
    w_x = jnp.dot(e_x.reshape(bt * n, h), seg_t,
                  preferred_element_type=f32).reshape(bt, n, c)               # (bt, N, C)
    w_c = jnp.dot(e_c, seg_t, preferred_element_type=f32)                     # (bt, C)
    den_c = jnp.dot(den, seg_t, preferred_element_type=f32)                   # (bt, C)

    num = w_c * v_c + jnp.sum(w_x * v_x.reshape(bt, n, c), axis=1)            # (bt, C)
    attn = num * lamb_ref[...] / den_c                                        # (bt, C)

    attn = jnp.dot(attn.astype(cdt), pw_ref[...],
                   preferred_element_type=f32) + pb_ref[...]

    # residual 1, norm2, MLP, residual 2 — all on a single row per sample
    xc1 = xc + g1_ref[...] * attn                                             # (bt, C)
    t2 = _layernorm(xc1, n2w_ref[...], n2b_ref[...])
    hid = _gelu_exact(jnp.dot(t2.astype(cdt), f1w_ref[...],
                              preferred_element_type=f32) + f1b_ref[...])
    mlp = jnp.dot(hid.astype(cdt), f2w_ref[...],
                  preferred_element_type=f32) + f2b_ref[...]
    y = xc1 + g2_ref[...] * mlp                                               # (bt, C)

    # every token row of the block output is identical -> store ONE row per
    # sample; the broadcast over tokens happens outside the kernel.
    out_ref[...] = y.reshape(bt, 1, c).astype(out_ref.dtype)


# ------------------------- capability / sizing helpers --------------------------

def _probe_kernel(x_ref, o_ref):
    o_ref[...] = x_ref[...]


@functools.lru_cache(maxsize=1)
def _single_buffer_weights_supported():
    """True if this Pallas/Mosaic accepts pipeline_mode=pl.Buffered(1) on TPU."""
    try:
        spec = pl.BlockSpec((8, 128), lambda i: (0, 0), pipeline_mode=pl.Buffered(1))
        fn = pl.pallas_call(
            _probe_kernel,
            out_shape=jax.ShapeDtypeStruct((8, 128), jnp.float32),
            grid=(2,),
            in_specs=[spec],
            out_specs=pl.BlockSpec((8, 128), lambda i: (0, 0)),
        )
        jax.block_until_ready(fn(jnp.zeros((8, 128), jnp.float32)))
        return True
    except Exception:
        return False


def _vmem_budget_bytes():
    # ~85% of physical VMEM, capped at 100 MiB: v5e/v6e (128 MiB) get large
    # tiles, v7x (64 MiB per TensorCore) stays safely within its budget.
    try:
        cap = int(pltpu.get_tpu_info().vmem_capacity_bytes)
    except Exception:
        cap = 64 * 1024 * 1024
    return min(int(cap * 0.85), 100 * 1024 * 1024)


def _num_tensorcores_per_chip():
    try:
        kind = jax.devices()[0].device_kind.lower()
    except Exception:
        return 1
    return 2 if ("v7" in kind or "7x" in kind) else 1


def _pick_batch_tile(batch, n, c, weight_bytes, vmem_budget, max_tile=64):
    # Rough per-sample VMEM footprint: double-buffered f32 (N, C) input tile
    # plus ~6 live f32 (N, C) intermediates inside the body (t_x / k_x / v_x /
    # qk_x / w_x / products); class-row scratch is negligible.
    per_sample = 4 * n * c * (2 + 6)
    avail = max(vmem_budget - weight_bytes, per_sample)
    return int(max(1, min(max_tile, batch, avail // per_sample)))


# ----------------------------------- wrapper ------------------------------------

def layerscale_block_ca(x, x_cls, params, num_heads, *,
                        compute_dtype=jnp.bfloat16, batch_tile=None):
    B, N, C = x.shape
    assert C % num_heads == 0
    n_tok = N + 1
    d = C // num_heads
    scale = float(d) ** -0.5
    hidden = params["fc1_w"].shape[1]
    f32 = jnp.float32
    cdt = compute_dtype

    # one-time host-side parameter prep: matmul weights in the compute dtype,
    # everything elementwise stays f32; GFSA (1 + lambda) expanded per channel.
    q_w = params["q_w"].astype(cdt)
    k_w = params["k_w"].astype(cdt)
    v_w = params["v_w"].astype(cdt)
    proj_w = params["proj_w"].astype(cdt)
    fc1_w = params["fc1_w"].astype(cdt)
    fc2_w = params["fc2_w"].astype(cdt)
    lamb1p_c = jnp.repeat((1.0 + params["lamb"]).astype(f32), d, axis=-1)      # (1, C)

    # head-indicator matrices, hoisted out of the kernel (exact 0/1 values)
    ci = jnp.arange(C)[:, None] // d
    hi = jnp.arange(num_heads)[None, :]
    seg = (ci == hi).astype(cdt)                 # (C, H) score head-reduce (big K)
    seg_t = (ci == hi).T.astype(f32)             # (H, C) head expand (tiny K, f32)

    weights = (params["n1_w"].astype(f32), params["n1_b"].astype(f32),
               q_w, k_w, v_w, proj_w, params["proj_b"].astype(f32),
               lamb1p_c, seg, seg_t,
               params["n2_w"].astype(f32), params["n2_b"].astype(f32),
               fc1_w, params["fc1_b"].astype(f32),
               fc2_w, params["fc2_b"].astype(f32),
               params["gamma_1"].astype(f32), params["gamma_2"].astype(f32))

    single_buf = _single_buffer_weights_supported()
    weight_bytes = sum(int(w.size) * w.dtype.itemsize for w in weights)
    if not single_buf:
        weight_bytes *= 2                        # default pipelining double-buffers
    vmem_budget = _vmem_budget_bytes()

    if batch_tile is not None:
        bt = int(batch_tile)
    else:
        bt = _pick_batch_tile(B, N, C, weight_bytes, vmem_budget)
        if _num_tensorcores_per_chip() >= 2 and B >= 2:
            bt = min(bt, -(-B // 2))             # >= 2 grid steps only with 2 TCs
    bt = max(1, min(bt, B))

    grid_b = pl.cdiv(B, bt)
    b_pad = grid_b * bt
    if b_pad != B:                               # pad instead of degrading to bt=1
        x = jnp.pad(x, ((0, b_pad - B), (0, 0), (0, 0)))
        x_cls = jnp.pad(x_cls, ((0, b_pad - B), (0, 0), (0, 0)))

    def rep(shape):  # replicated parameter (constant window across the grid)
        if single_buf:
            return pl.BlockSpec(shape, lambda b: (0,) * len(shape),
                                pipeline_mode=pl.Buffered(1))
        return pl.BlockSpec(shape, lambda b: (0,) * len(shape))

    in_specs = [
        pl.BlockSpec((bt, N, C), lambda b: (b, 0, 0)),      # x (patch tokens)
        pl.BlockSpec((bt, 1, C), lambda b: (b, 0, 0)),      # x_cls
        rep((1, C)), rep((1, C)),                           # norm1 w/b
        rep((C, C)), rep((C, C)), rep((C, C)),              # q/k/v weights
        rep((C, C)), rep((1, C)),                           # proj w/b
        rep((1, C)),                                        # (1 + lamb) per channel
        rep((C, num_heads)), rep((num_heads, C)),           # seg, seg_t
        rep((1, C)), rep((1, C)),                           # norm2 w/b
        rep((C, hidden)), rep((1, hidden)),                 # fc1 w/b
        rep((hidden, C)), rep((1, C)),                      # fc2 w/b
        rep((1, C)), rep((1, C)),                           # gamma_1, gamma_2
    ]

    kernel = functools.partial(block_ca_kernel, qk_scale=scale)

    # advisory cost estimate so XLA can schedule surrounding ops
    flops = int(2 * b_pad * N * C * C * 2            # k_x, v_x projections
                + 2 * b_pad * C * C * 4              # q / k_c / v_c / proj (class row)
                + 4 * b_pad * N * C * num_heads      # head reduce / expand
                + 2 * b_pad * C * hidden * 2)        # fc1 + fc2 on the class row
    transcendentals = int(b_pad * (N + 1) * num_heads + b_pad * hidden + b_pad * C)
    bytes_accessed = int(4 * (x.size + x_cls.size + b_pad * C) + weight_bytes)

    out = pl.pallas_call(
        kernel,
        out_shape=jax.ShapeDtypeStruct((b_pad, 1, C), x.dtype),
        grid=(grid_b,),
        in_specs=in_specs,
        out_specs=pl.BlockSpec((bt, 1, C), lambda b: (b, 0, 0)),
        compiler_params=pltpu.CompilerParams(
            dimension_semantics=("parallel",),
            vmem_limit_bytes=vmem_budget),
        cost_estimate=pl.CostEstimate(
            flops=flops, transcendentals=transcendentals,
            bytes_accessed=bytes_accessed),
    )(x, x_cls, *weights)

    # all N+1 token rows are identical; broadcast outside the kernel (the kernel
    # only wrote one row per sample -> ~half the kernel HBM traffic).
    return jnp.broadcast_to(out[:B], (B, n_tok, C))


# ------------------------------ pure-JAX reference -------------------------------
# Faithful to the PyTorch spec under the broadcast interpretation (full GFSA
# reaction with the identity matrix, no algebraic simplification).

def reference_forward(x, x_cls, p, num_heads):
    B, N, C = x.shape
    H, d = num_heads, C // num_heads
    scale = d ** -0.5
    u = jnp.concatenate([x_cls, x], axis=1)
    Nt = N + 1
    t = _layernorm(u, p["n1_w"][0], p["n1_b"][0])
    q = (t[:, 0:1] @ p["q_w"]).reshape(B, 1, H, d).transpose(0, 2, 1, 3) * scale
    k = (t @ p["k_w"]).reshape(B, Nt, H, d).transpose(0, 2, 1, 3)
    v = (t @ p["v_w"]).reshape(B, Nt, H, d).transpose(0, 2, 1, 3)
    attn = jax.nn.softmax(q @ jnp.swapaxes(k, -1, -2), axis=-1)      # (B,H,1,Nt)
    a = jnp.broadcast_to(attn, (B, H, Nt, Nt))
    eye = jnp.eye(Nt, dtype=x.dtype)
    reaction = 3.0 * ((a - eye) @ a) + a
    a_hat = a + p["lamb"][0][None, :, None, None] * reaction
    y = (a_hat @ v).transpose(0, 2, 1, 3).reshape(B, Nt, C)
    y = y @ p["proj_w"] + p["proj_b"][0]
    xc = x_cls + p["gamma_1"][0] * y
    t2 = _layernorm(xc, p["n2_w"][0], p["n2_b"][0])
    mlp = _gelu_exact(t2 @ p["fc1_w"] + p["fc1_b"][0]) @ p["fc2_w"] + p["fc2_b"][0]
    return xc + p["gamma_2"][0] * mlp


# ------------------------------------- main --------------------------------------

if __name__ == "__main__":
    B, N, C, H = 2, 8, 32, 4          # small shapes: dim=32, num_heads=4, 8 patch tokens
    mlp_ratio = 4.0
    hidden = int(C * mlp_ratio)

    key = jax.random.PRNGKey(0)
    ks = jax.random.split(key, 16)

    def rnd(k, shape, s=0.02):
        return (s * jax.random.normal(k, shape)).astype(jnp.float32)

    params = dict(
        n1_w=(1.0 + 0.1 * jax.random.normal(ks[0], (1, C))).astype(jnp.float32),
        n1_b=rnd(ks[1], (1, C), 0.05),
        q_w=rnd(ks[2], (C, C)),
        k_w=rnd(ks[3], (C, C)),
        v_w=rnd(ks[4], (C, C)),
        proj_w=rnd(ks[5], (C, C)),
        proj_b=rnd(ks[6], (1, C), 0.02),
        lamb=rnd(ks[7], (1, H), 0.2),          # nonzero so the GFSA path is exercised
        n2_w=(1.0 + 0.1 * jax.random.normal(ks[8], (1, C))).astype(jnp.float32),
        n2_b=rnd(ks[9], (1, C), 0.05),
        fc1_w=rnd(ks[10], (C, hidden)),
        fc1_b=rnd(ks[11], (1, hidden), 0.02),
        fc2_w=rnd(ks[12], (hidden, C)),
        fc2_b=rnd(ks[13], (1, C), 0.02),
        gamma_1=(1e-4 * jnp.ones((1, C))).astype(jnp.float32),   # init_values = 1e-4
        gamma_2=(1e-4 * jnp.ones((1, C))).astype(jnp.float32),
    )

    x = jax.random.normal(ks[14], (B, N, C), jnp.float32)
    x_cls = jax.random.normal(ks[15], (B, 1, C), jnp.float32)

    # 1) f32 compute path — tight check against the pure-JAX reference.
    out_f32 = jax.block_until_ready(
        layerscale_block_ca(x, x_cls, params, num_heads=H, compute_dtype=jnp.float32))
    with jax.default_matmul_precision("highest"):
        ref = jax.block_until_ready(reference_forward(x, x_cls, params, num_heads=H))
    assert out_f32.shape == (B, N + 1, C), out_f32.shape
    np.testing.assert_allclose(np.asarray(out_f32), np.asarray(ref), atol=2e-5, rtol=2e-5)

    # 2) bf16 compute path (production default) on an odd batch with a forced
    #    batch tile, so the batch-padding logic is exercised; looser tolerance.
    B2 = 3
    x2 = jax.random.normal(jax.random.PRNGKey(1), (B2, N, C), jnp.float32)
    xc2 = jax.random.normal(jax.random.PRNGKey(2), (B2, 1, C), jnp.float32)
    out_bf16 = jax.block_until_ready(
        layerscale_block_ca(x2, xc2, params, num_heads=H, batch_tile=2))
    with jax.default_matmul_precision("highest"):
        ref2 = jax.block_until_ready(reference_forward(x2, xc2, params, num_heads=H))
    assert out_bf16.shape == (B2, N + 1, C), out_bf16.shape
    np.testing.assert_allclose(np.asarray(out_bf16), np.asarray(ref2), atol=5e-3, rtol=5e-2)

    print("KERNEL_OK")
</pallas_src>

<mosaic_0001>
module attributes {stable_mosaic.version = 11 : i64} {
  func.func @_probe_kernel(%arg0: i32, %arg1: memref<8x128xf32, #tpu.memory_space<vmem>>, %arg2: memref<8x128xf32, #tpu.memory_space<vmem>>) attributes {dimension_semantics = [#tpu.dimension_semantics<arbitrary>], iteration_bounds = array<i64: 2>, scalar_prefetch = 0 : i64, scratch_operands = 0 : i64, tpu.core_type = #tpu.core_type<tc>, window_params = [{pipeline_mode = #tpu.pipeline_mode<synchronous>, transform_indices = @transform_0, window_bounds = array<i64: 8, 128>}, {pipeline_mode = #tpu.pipeline_mode<synchronous>, transform_indices = @transform_1, window_bounds = array<i64: 8, 128>}]} {
    %c0 = arith.constant 0 : index
    %c0_0 = arith.constant 0 : index
    %0 = vector.load %arg1[%c0, %c0_0] : memref<8x128xf32, #tpu.memory_space<vmem>>, vector<8x128xf32>
    %c0_1 = arith.constant 0 : index
    %c0_2 = arith.constant 0 : index
    %1 = vector.load %arg2[%c0_1, %c0_2] : memref<8x128xf32, #tpu.memory_space<vmem>>, vector<8x128xf32>
    tpu.vector_store %arg2[%c0_1, %c0_2], %0 {strides = array<i32>} : memref<8x128xf32, #tpu.memory_space<vmem>>, vector<8x128xf32>,
    return
  }
  func.func @transform_0(%arg0: i32) -> (i32, i32) {
    %c0_i32 = arith.constant 0 : i32
    %c0_i32_0 = arith.constant 0 : i32
    %c0_i32_1 = arith.constant 0 : i32
    return %c0_i32, %c0_i32_0 : i32, i32
  }
  func.func @transform_1(%arg0: i32) -> (i32, i32) {
    %c0_i32 = arith.constant 0 : i32
    %c0_i32_0 = arith.constant 0 : i32
    %c0_i32_1 = arith.constant 0 : i32
    return %c0_i32, %c0_i32_0 : i32, i32
  }
}

module attributes {stable_mosaic.version = 11 : i64} {
  func.func @block_ca_kernel(%arg0: i32, %arg1: memref<2x8x32xf32, #tpu.memory_space<vmem>>, %arg2: memref<2x1x32xf32, #tpu.memory_space<vmem>>, %arg3: memref<1x32xf32, #tpu.memory_space<vmem>>, %arg4: memref<1x32xf32, #tpu.memory_space<vmem>>, %arg5: memref<32x32xf32, #tpu.memory_space<vmem>>, %arg6: memref<32x32xf32, #tpu.memory_space<vmem>>, %arg7: memref<32x32xf32, #tpu.memory_space<vmem>>, %arg8: memref<32x32xf32, #tpu.memory_space<vmem>>, %arg9: memref<1x32xf32, #tpu.memory_space<vmem>>, %arg10: memref<1x32xf32, #tpu.memory_space<vmem>>, %arg11: memref<32x4xf32, #tpu.memory_space<vmem>>, %arg12: memref<4x32xf32, #tpu.memory_space<vmem>>, %arg13: memref<1x32xf32, #tpu.memory_space<vmem>>, %arg14: memref<1x32xf32, #tpu.memory_space<vmem>>, %arg15: memref<32x128xf32, #tpu.memory_space<vmem>>, %arg16: memref<1x128xf32, #tpu.memory_space<vmem>>, %arg17: memref<128x32xf32, #tpu.memory_space<vmem>>, %arg18: memref<1x32xf32, #tpu.memory_space<vmem>>, %arg19: memref<1x32xf32, #tpu.memory_space<vmem>>, %arg20: memref<1x32xf32, #tpu.memory_space<vmem>>, %arg21: memref<2x1x32xf32, #tpu.memory_space<vmem>>) attributes {dimension_semantics = [#tpu.dimension_semantics<parallel>], iteration_bounds = array<i64: 1>, scalar_prefetch = 0 : i64, scratch_operands = 0 : i64, tpu.core_type = #tpu.core_type<tc>, window_params = [{transform_indices = @transform_0, window_bounds = array<i64: 2, 8, 32>}, {transform_indices = @transform_1, window_bounds = array<i64: 2, 1, 32>}, {pipeline_mode = #tpu.pipeline_mode<synchronous>, transform_indices = @transform_2, window_bounds = array<i64: 1, 32>}, {pipeline_mode = #tpu.pipeline_mode<synchronous>, transform_indices = @transform_3, window_bounds = array<i64: 1, 32>}, {pipeline_mode = #tpu.pipeline_mode<synchronous>, transform_indices = @transform_4, window_bounds = array<i64: 32, 32>}, {pipeline_mode = #tpu.pipeline_mode<synchronous>, transform_indices = @transform_5, window_bounds = array<i64: 32, 32>}, {pipeline_mode = #tpu.pipeline_mode<synchronous>, transform_indices = @transform_6, window_bounds = array<i64: 32, 32>}, {pipeline_mode = #tpu.pipeline_mode<synchronous>, transform_indices = @transform_7, window_bounds = array<i64: 32, 32>}, {pipeline_mode = #tpu.pipeline_mode<synchronous>, transform_indices = @transform_8, window_bounds = array<i64: 1, 32>}, {pipeline_mode = #tpu.pipeline_mode<synchronous>, transform_indices = @transform_9, window_bounds = array<i64: 1, 32>}, {pipeline_mode = #tpu.pipeline_mode<synchronous>, transform_indices = @transform_10, window_bounds = array<i64: 32, 4>}, {pipeline_mode = #tpu.pipeline_mode<synchronous>, transform_indices = @transform_11, window_bounds = array<i64: 4, 32>}, {pipeline_mode = #tpu.pipeline_mode<synchronous>, transform_indices = @transform_12, window_bounds = array<i64: 1, 32>}, {pipeline_mode = #tpu.pipeline_mode<synchronous>, transform_indices = @transform_13, window_bounds = array<i64: 1, 32>}, {pipeline_mode = #tpu.pipeline_mode<synchronous>, transform_indices = @transform_14, window_bounds = array<i64: 32, 128>}, {pipeline_mode = #tpu.pipeline_mode<synchronous>, transform_indices = @transform_15, window_bounds = array<i64: 1, 128>}, {pipeline_mode = #tpu.pipeline_mode<synchronous>, transform_indices = @transform_16, window_bounds = array<i64: 128, 32>}, {pipeline_mode = #tpu.pipeline_mode<synchronous>, transform_indices = @transform_17, window_bounds = array<i64: 1, 32>}, {pipeline_mode = #tpu.pipeline_mode<synchronous>, transform_indices = @transform_18, window_bounds = array<i64: 1, 32>}, {pipeline_mode = #tpu.pipeline_mode<synchronous>, transform_indices = @transform_19, window_bounds = array<i64: 1, 32>}, {transform_indices = @transform_20, window_bounds = array<i64: 2, 1, 32>}]} {
    %c0 = arith.constant 0 : index
    %c0_0 = arith.constant 0 : index
    %c0_1 = arith.constant 0 : index
    %0 = vector.load %arg1[%c0, %c0_0, %c0_1] : memref<2x8x32xf32, #tpu.memory_space<vmem>>, vector<2x8x32xf32>
    %1 = vector.shape_cast %0 : vector<2x8x32xf32> to vector<16x32xf32>
    %c0_2 = arith.constant 0 : index
    %c0_3 = arith.constant 0 : index
    %c0_4 = arith.constant 0 : index
    %2 = vector.load %arg2[%c0_2, %c0_3, %c0_4] : memref<2x1x32xf32, #tpu.memory_space<vmem>>, vector<2x1x32xf32>
    %3 = vector.shape_cast %2 : vector<2x1x32xf32> to vector<2x32xf32>
    %c0_5 = arith.constant 0 : index
    %c0_6 = arith.constant 0 : index
    %4 = vector.load %arg3[%c0_5, %c0_6] : memref<1x32xf32, #tpu.memory_space<vmem>>, vector<1x32xf32>
    %c0_7 = arith.constant 0 : index
    %c0_8 = arith.constant 0 : index
    %5 = vector.load %arg4[%c0_7, %c0_8] : memref<1x32xf32, #tpu.memory_space<vmem>>, vector<1x32xf32>
    %cst = arith.constant dense<0.000000e+00> : vector<16xf32>
    %6 = vector.multi_reduction <add>, %1, %cst [1] : vector<16x32xf32> to vector<16xf32>
    %7 = vector.shape_cast %6 : vector<16xf32> to vector<16x1xf32>
    %cst_9 = arith.constant 3.200000e+01 : f32
    %8 = vector.broadcast %cst_9 : f32 to vector<16x1xf32>
    %9 = arith.divf %7, %8 : vector<16x1xf32>
    %10 = vector.broadcast %9 : vector<16x1xf32> to vector<16x32xf32>
    %11 = arith.subf %1, %10 : vector<16x32xf32>
    %12 = arith.mulf %11, %11 : vector<16x32xf32>
    %cst_10 = arith.constant dense<0.000000e+00> : vector<16xf32>
    %13 = vector.multi_reduction <add>, %12, %cst_10 [1] : vector<16x32xf32> to vector<16xf32>
    %14 = vector.shape_cast %13 : vector<16xf32> to vector<16x1xf32>
    %cst_11 = arith.constant 3.200000e+01 : f32
    %15 = vector.broadcast %cst_11 : f32 to vector<16x1xf32>
    %16 = arith.divf %14, %15 : vector<16x1xf32>
    %17 = vector.broadcast %9 : vector<16x1xf32> to vector<16x32xf32>
    %18 = arith.subf %1, %17 : vector<16x32xf32>
    %cst_12 = arith.constant 9.99999974E-6 : f32
    %19 = vector.broadcast %cst_12 : f32 to vector<16x1xf32>
    %20 = arith.addf %16, %19 : vector<16x1xf32>
    %21 = math.rsqrt %20 : vector<16x1xf32>
    %22 = vector.broadcast %21 : vector<16x1xf32> to vector<16x32xf32>
    %23 = arith.mulf %18, %22 : vector<16x32xf32>
    %24 = vector.broadcast %4 : vector<1x32xf32> to vector<16x32xf32>
    %25 = arith.mulf %23, %24 : vector<16x32xf32>
    %26 = vector.broadcast %5 : vector<1x32xf32> to vector<16x32xf32>
    %27 = arith.addf %25, %26 : vector<16x32xf32>
    %cst_13 = arith.constant dense<0.000000e+00> : vector<2xf32>
    %28 = vector.multi_reduction <add>, %3, %cst_13 [1] : vector<2x32xf32> to vector<2xf32>
    %29 = vector.shape_cast %28 : vector<2xf32> to vector<2x1xf32>
    %cst_14 = arith.constant 3.200000e+01 : f32
    %30 = vector.broadcast %cst_14 : f32 to vector<2x1xf32>
    %31 = arith.divf %29, %30 : vector<2x1xf32>
    %32 = vector.broadcast %31 : vector<2x1xf32> to vector<2x32xf32>
    %33 = arith.subf %3, %32 : vector<2x32xf32>
    %34 = arith.mulf %33, %33 : vector<2x32xf32>
    %cst_15 = arith.constant dense<0.000000e+00> : vector<2xf32>
    %35 = vector.multi_reduction <add>, %34, %cst_15 [1] : vector<2x32xf32> to vector<2xf32>
    %36 = vector.shape_cast %35 : vector<2xf32> to vector<2x1xf32>
    %cst_16 = arith.constant 3.200000e+01 : f32
    %37 = vector.broadcast %cst_16 : f32 to vector<2x1xf32>
    %38 = arith.divf %36, %37 : vector<2x1xf32>
    %39 = vector.broadcast %31 : vector<2x1xf32> to vector<2x32xf32>
    %40 = arith.subf %3, %39 : vector<2x32xf32>
    %cst_17 = arith.constant 9.99999974E-6 : f32
    %41 = vector.broadcast %cst_17 : f32 to vector<2x1xf32>
    %42 = arith.addf %38, %41 : vector<2x1xf32>
    %43 = math.rsqrt %42 : vector<2x1xf32>
    %44 = vector.broadcast %43 : vector<2x1xf32> to vector<2x32xf32>
    %45 = arith.mulf %40, %44 : vector<2x32xf32>
    %46 = vector.broadcast %4 : vector<1x32xf32> to vector<2x32xf32>
    %47 = arith.mulf %45, %46 : vector<2x32xf32>
    %48 = vector.broadcast %5 : vector<1x32xf32> to vector<2x32xf32>
    %49 = arith.addf %47, %48 : vector<2x32xf32>
    %c0_18 = arith.constant 0 : index
    %c0_19 = arith.constant 0 : index
    %50 = vector.load %arg5[%c0_18, %c0_19] : memref<32x32xf32, #tpu.memory_space<vmem>>, vector<32x32xf32>
    %cst_20 = arith.constant dense<0.000000e+00> : vector<2x32xf32>
    %51 = tpu.matmul %49, %50, %cst_20 {dimension_numbers = #tpu.dot_dimension_numbers<[1], [0], [0], [1], [0, 0, 1, 1], [], []>} : vector<2x32xf32>, vector<32x32xf32>, vector<2x32xf32> -> vector<2x32xf32>
    %cst_21 = arith.constant 0.353553385 : f32
    %52 = vector.broadcast %cst_21 : f32 to vector<2x32xf32>
    %53 = arith.mulf %51, %52 : vector<2x32xf32>
    %c0_22 = arith.constant 0 : index
    %c0_23 = arith.constant 0 : index
    %54 = vector.load %arg6[%c0_22, %c0_23] : memref<32x32xf32, #tpu.memory_space<vmem>>, vector<32x32xf32>
    %cst_24 = arith.constant dense<0.000000e+00> : vector<2x32xf32>
    %55 = tpu.matmul %49, %54, %cst_24 {dimension_numbers = #tpu.dot_dimension_numbers<[1], [0], [0], [1], [0, 0, 1, 1], [], []>} : vector<2x32xf32>, vector<32x32xf32>, vector<2x32xf32> -> vector<2x32xf32>
    %c0_25 = arith.constant 0 : index
    %c0_26 = arith.constant 0 : index
    %56 = vector.load %arg7[%c0_25, %c0_26] : memref<32x32xf32, #tpu.memory_space<vmem>>, vector<32x32xf32>
    %cst_27 = arith.constant dense<0.000000e+00> : vector<2x32xf32>
    %57 = tpu.matmul %49, %56, %cst_27 {dimension_numbers = #tpu.dot_dimension_numbers<[1], [0], [0], [1], [0, 0, 1, 1], [], []>} : vector<2x32xf32>, vector<32x32xf32>, vector<2x32xf32> -> vector<2x32xf32>
    %c0_28 = arith.constant 0 : index
    %c0_29 = arith.constant 0 : index
    %58 = vector.load %arg6[%c0_28, %c0_29] : memref<32x32xf32, #tpu.memory_space<vmem>>, vector<32x32xf32>
    %cst_30 = arith.constant dense<0.000000e+00> : vector<16x32xf32>
    %59 = tpu.matmul %27, %58, %cst_30 {dimension_numbers = #tpu.dot_dimension_numbers<[1], [0], [0], [1], [0, 0, 1, 1], [], []>} : vector<16x32xf32>, vector<32x32xf32>, vector<16x32xf32> -> vector<16x32xf32>
    %c0_31 = arith.constant 0 : index
    %c0_32 = arith.constant 0 : index
    %60 = vector.load %arg7[%c0_31, %c0_32] : memref<32x32xf32, #tpu.memory_space<vmem>>, vector<32x32xf32>
    %cst_33 = arith.constant dense<0.000000e+00> : vector<16x32xf32>
    %61 = tpu.matmul %27, %60, %cst_33 {dimension_numbers = #tpu.dot_dimension_numbers<[1], [0], [0], [1], [0, 0, 1, 1], [], []>} : vector<16x32xf32>, vector<32x32xf32>, vector<16x32xf32> -> vector<16x32xf32>
    %c0_34 = arith.constant 0 : index
    %c0_35 = arith.constant 0 : index
    %62 = vector.load %arg11[%c0_34, %c0_35] : memref<32x4xf32, #tpu.memory_space<vmem>>, vector<32x4xf32>
    %c0_36 = arith.constant 0 : index
    %c0_37 = arith.constant 0 : index
    %63 = vector.load %arg12[%c0_36, %c0_37] : memref<4x32xf32, #tpu.memory_space<vmem>>, vector<4x32xf32>
    %64 = vector.shape_cast %53 : vector<2x32xf32> to vector<2x1x32xf32>
    %65 = vector.shape_cast %59 : vector<16x32xf32> to vector<2x8x32xf32>
    %66 = vector.broadcast %64 : vector<2x1x32xf32> to vector<2x8x32xf32>
    %67 = arith.mulf %66, %65 : vector<2x8x32xf32>
    %68 = vector.shape_cast %67 : vector<2x8x32xf32> to vector<16x32xf32>
    %cst_38 = arith.constant dense<0.000000e+00> : vector<16x4xf32>
    %69 = tpu.matmul %68, %62, %cst_38 {dimension_numbers = #tpu.dot_dimension_numbers<[1], [0], [0], [1], [0, 0, 1, 1], [], []>} : vector<16x32xf32>, vector<32x4xf32>, vector<16x4xf32> -> vector<16x4xf32>
    %70 = vector.shape_cast %69 : vector<16x4xf32> to vector<2x8x4xf32>
    %71 = arith.mulf %53, %55 : vector<2x32xf32>
    %cst_39 = arith.constant dense<0.000000e+00> : vector<2x4xf32>
    %72 = tpu.matmul %71, %62, %cst_39 {dimension_numbers = #tpu.dot_dimension_numbers<[1], [0], [0], [1], [0, 0, 1, 1], [], []>} : vector<2x32xf32>, vector<32x4xf32>, vector<2x4xf32> -> vector<2x4xf32>
    %cst_40 = arith.constant dense<0xFF800000> : vector<2x4xf32>
    %73 = vector.multi_reduction <maximumf>, %70, %cst_40 [1] : vector<2x8x4xf32> to vector<2x4xf32>
    %74 = arith.maximumf %73, %72 : vector<2x4xf32>
    %75 = vector.shape_cast %74 : vector<2x4xf32> to vector<2x1x4xf32>
    %76 = vector.broadcast %75 : vector<2x1x4xf32> to vector<2x8x4xf32>
    %77 = arith.subf %70, %76 : vector<2x8x4xf32>
    %78 = math.exp %77 : vector<2x8x4xf32>
    %79 = arith.subf %72, %74 : vector<2x4xf32>
    %80 = math.exp %79 : vector<2x4xf32>
    %cst_41 = arith.constant dense<0.000000e+00> : vector<2x4xf32>
    %81 = vector.multi_reduction <add>, %78, %cst_41 [1] : vector<2x8x4xf32> to vector<2x4xf32>
    %82 = arith.addf %80, %81 : vector<2x4xf32>
    %83 = vector.shape_cast %78 : vector<2x8x4xf32> to vector<16x4xf32>
    %cst_42 = arith.constant dense<0.000000e+00> : vector<16x32xf32>
    %84 = tpu.matmul %83, %63, %cst_42 {dimension_numbers = #tpu.dot_dimension_numbers<[1], [0], [0], [1], [0, 0, 1, 1], [], []>} : vector<16x4xf32>, vector<4x32xf32>, vector<16x32xf32> -> vector<16x32xf32>
    %85 = vector.shape_cast %84 : vector<16x32xf32> to vector<2x8x32xf32>
    %cst_43 = arith.constant dense<0.000000e+00> : vector<2x32xf32>
    %86 = tpu.matmul %80, %63, %cst_43 {dimension_numbers = #tpu.dot_dimension_numbers<[1], [0], [0], [1], [0, 0, 1, 1], [], []>} : vector<2x4xf32>, vector<4x32xf32>, vector<2x32xf32> -> vector<2x32xf32>
    %cst_44 = arith.constant dense<0.000000e+00> : vector<2x32xf32>
    %87 = tpu.matmul %82, %63, %cst_44 {dimension_numbers = #tpu.dot_dimension_numbers<[1], [0], [0], [1], [0, 0, 1, 1], [], []>} : vector<2x4xf32>, vector<4x32xf32>, vector<2x32xf32> -> vector<2x32xf32>
    %88 = arith.mulf %86, %57 : vector<2x32xf32>
    %89 = vector.shape_cast %61 : vector<16x32xf32> to vector<2x8x32xf32>
    %90 = arith.mulf %85, %89 : vector<2x8x32xf32>
    %cst_45 = arith.constant dense<0.000000e+00> : vector<2x32xf32>
    %91 = vector.multi_reduction <add>, %90, %cst_45 [1] : vector<2x8x32xf32> to vector<2x32xf32>
    %92 = arith.addf %88, %91 : vector<2x32xf32>
    %c0_46 = arith.constant 0 : index
    %c0_47 = arith.constant 0 : index
    %93 = vector.load %arg10[%c0_46, %c0_47] : memref<1x32xf32, #tpu.memory_space<vmem>>, vector<1x32xf32>
    %94 = vector.broadcast %93 : vector<1x32xf32> to vector<2x32xf32>
    %95 = arith.mulf %92, %94 : vector<2x32xf32>
    %96 = arith.divf %95, %87 : vector<2x32xf32>
    %c0_48 = arith.constant 0 : index
    %c0_49 = arith.constant 0 : index
    %97 = vector.load %arg8[%c0_48, %c0_49] : memref<32x32xf32, #tpu.memory_space<vmem>>, vector<32x32xf32>
    %cst_50 = arith.constant dense<0.000000e+00> : vector<2x32xf32>
    %98 = tpu.matmul %96, %97, %cst_50 {dimension_numbers = #tpu.dot_dimension_numbers<[1], [0], [0], [1], [0, 0, 1, 1], [], []>} : vector<2x32xf32>, vector<32x32xf32>, vector<2x32xf32> -> vector<2x32xf32>
    %c0_51 = arith.constant 0 : index
    %c0_52 = arith.constant 0 : index
    %99 = vector.load %arg9[%c0_51, %c0_52] : memref<1x32xf32, #tpu.memory_space<vmem>>, vector<1x32xf32>
    %100 = vector.broadcast %99 : vector<1x32xf32> to vector<2x32xf32>
    %101 = arith.addf %98, %100 : vector<2x32xf32>
    %c0_53 = arith.constant 0 : index
    %c0_54 = arith.constant 0 : index
    %102 = vector.load %arg19[%c0_53, %c0_54] : memref<1x32xf32, #tpu.memory_space<vmem>>, vector<1x32xf32>
    %103 = vector.broadcast %102 : vector<1x32xf32> to vector<2x32xf32>
    %104 = arith.mulf %103, %101 : vector<2x32xf32>
    %105 = arith.addf %3, %104 : vector<2x32xf32>
    %c0_55 = arith.constant 0 : index
    %c0_56 = arith.constant 0 : index
    %106 = vector.load %arg13[%c0_55, %c0_56] : memref<1x32xf32, #tpu.memory_space<vmem>>, vector<1x32xf32>
    %c0_57 = arith.constant 0 : index
    %c0_58 = arith.constant 0 : index
    %107 = vector.load %arg14[%c0_57, %c0_58] : memref<1x32xf32, #tpu.memory_space<vmem>>, vector<1x32xf32>
    %cst_59 = arith.constant dense<0.000000e+00> : vector<2xf32>
    %108 = vector.multi_reduction <add>, %105, %cst_59 [1] : vector<2x32xf32> to vector<2xf32>
    %109 = vector.shape_cast %108 : vector<2xf32> to vector<2x1xf32>
    %cst_60 = arith.constant 3.200000e+01 : f32
    %110 = vector.broadcast %cst_60 : f32 to vector<2x1xf32>
    %111 = arith.divf %109, %110 : vector<2x1xf32>
    %112 = vector.broadcast %111 : vector<2x1xf32> to vector<2x32xf32>
    %113 = arith.subf %105, %112 : vector<2x32xf32>
    %114 = arith.mulf %113, %113 : vector<2x32xf32>
    %cst_61 = arith.constant dense<0.000000e+00> : vector<2xf32>
    %115 = vector.multi_reduction <add>, %114, %cst_61 [1] : vector<2x32xf32> to vector<2xf32>
    %116 = vector.shape_cast %115 : vector<2xf32> to vector<2x1xf32>
    %cst_62 = arith.constant 3.200000e+01 : f32
    %117 = vector.broadcast %cst_62 : f32 to vector<2x1xf32>
    %118 = arith.divf %116, %117 : vector<2x1xf32>
    %119 = vector.broadcast %111 : vector<2x1xf32> to vector<2x32xf32>
    %120 = arith.subf %105, %119 : vector<2x32xf32>
    %cst_63 = arith.constant 9.99999974E-6 : f32
    %121 = vector.broadcast %cst_63 : f32 to vector<2x1xf32>
    %122 = arith.addf %118, %121 : vector<2x1xf32>
    %123 = math.rsqrt %122 : vector<2x1xf32>
    %124 = vector.broadcast %123 : vector<2x1xf32> to vector<2x32xf32>
    %125 = arith.mulf %120, %124 : vector<2x32xf32>
    %126 = vector.broadcast %106 : vector<1x32xf32> to vector<2x32xf32>
    %127 = arith.mulf %125, %126 : vector<2x32xf32>
    %128 = vector.broadcast %107 : vector<1x32xf32> to vector<2x32xf32>
    %129 = arith.addf %127, %128 : vector<2x32xf32>
    %c0_64 = arith.constant 0 : index
    %c0_65 = arith.constant 0 : index
    %130 = vector.load %arg15[%c0_64, %c0_65] : memref<32x128xf32, #tpu.memory_space<vmem>>, vector<32x128xf32>
    %cst_66 = arith.constant dense<0.000000e+00> : vector<2x128xf32>
    %131 = tpu.matmul %129, %130, %cst_66 {dimension_numbers = #tpu.dot_dimension_numbers<[1], [0], [0], [1], [0, 0, 1, 1], [], []>} : vector<2x32xf32>, vector<32x128xf32>, vector<2x128xf32> -> vector<2x128xf32>
    %c0_67 = arith.constant 0 : index
    %c0_68 = arith.constant 0 : index
    %132 = vector.load %arg16[%c0_67, %c0_68] : memref<1x128xf32, #tpu.memory_space<vmem>>, vector<1x128xf32>
    %133 = vector.broadcast %132 : vector<1x128xf32> to vector<2x128xf32>
    %134 = arith.addf %131, %133 : vector<2x128xf32>
    %cst_69 = arith.constant 5.000000e-01 : f32
    %135 = vector.broadcast %cst_69 : f32 to vector<2x128xf32>
    %136 = arith.mulf %135, %134 : vector<2x128xf32>
    %cst_70 = arith.constant 0.707106769 : f32
    %137 = vector.broadcast %cst_70 : f32 to vector<2x128xf32>
    %138 = arith.mulf %134, %137 : vector<2x128xf32>
    %139 = math.erf %138 : vector<2x128xf32>
    %cst_71 = arith.constant 1.000000e+00 : f32
    %140 = vector.broadcast %cst_71 : f32 to vector<2x128xf32>
    %141 = arith.addf %140, %139 : vector<2x128xf32>
    %142 = arith.mulf %136, %141 : vector<2x128xf32>
    %c0_72 = arith.constant 0 : index
    %c0_73 = arith.constant 0 : index
    %143 = vector.load %arg17[%c0_72, %c0_73] : memref<128x32xf32, #tpu.memory_space<vmem>>, vector<128x32xf32>
    %cst_74 = arith.constant dense<0.000000e+00> : vector<2x32xf32>
    %144 = tpu.matmul %142, %143, %cst_74 {dimension_numbers = #tpu.dot_dimension_numbers<[1], [0], [0], [1], [0, 0, 1, 1], [], []>} : vector<2x128xf32>, vector<128x32xf32>, vector<2x32xf32> -> vector<2x32xf32>
    %c0_75 = arith.constant 0 : index
    %c0_76 = arith.constant 0 : index
    %145 = vector.load %arg18[%c0_75, %c0_76] : memref<1x32xf32, #tpu.memory_space<vmem>>, vector<1x32xf32>
    %146 = vector.broadcast %145 : vector<1x32xf32> to vector<2x32xf32>
    %147 = arith.addf %144, %146 : vector<2x32xf32>
    %c0_77 = arith.constant 0 : index
    %c0_78 = arith.constant 0 : index
    %148 = vector.load %arg20[%c0_77, %c0_78] : memref<1x32xf32, #tpu.memory_space<vmem>>, vector<1x32xf32>
    %149 = vector.broadcast %148 : vector<1x32xf32> to vector<2x32xf32>
    %150 = arith.mulf %149, %147 : vector<2x32xf32>
    %151 = arith.addf %105, %150 : vector<2x32xf32>
    %152 = vector.shape_cast %151 : vector<2x32xf32> to vector<2x1x32xf32>
    %c0_79 = arith.constant 0 : index
    %c0_80 = arith.constant 0 : index
    %c0_81 = arith.constant 0 : index
    %153 = vector.load %arg21[%c0_79, %c0_80, %c0_81] : memref<2x1x32xf32, #tpu.memory_space<vmem>>, vector<2x1x32xf32>
    tpu.vector_store %arg21[%c0_79, %c0_80, %c0_81], %152 {strides = array<i32>} : memref<2x1x32xf32, #tpu.memory_space<vmem>>, vector<2x1x32xf32>,
    return
  }
  func.func @transform_0(%arg0: i32) -> (i32, i32, i32) {
    %c0_i32 = arith.constant 0 : i32
    %c0_i32_0 = arith.constant 0 : i32
    %c0_i32_1 = arith.constant 0 : i32
    return %arg0, %c0_i32, %c0_i32_0 : i32, i32, i32
  }
  func.func @transform_1(%arg0: i32) -> (i32, i32, i32) {
    %c0_i32 = arith.constant 0 : i32
    %c0_i32_0 = arith.constant 0 : i32
    %c0_i32_1 = arith.constant 0 : i32
    return %arg0, %c0_i32, %c0_i32_0 : i32, i32, i32
  }
  func.func @transform_2(%arg0: i32) -> (i32, i32) {
    %c0_i32 = arith.constant 0 : i32
    %c0_i32_0 = arith.constant 0 : i32
    %c0_i32_1 = arith.constant 0 : i32
    return %c0_i32, %c0_i32_0 : i32, i32
  }
  func.func @transform_3(%arg0: i32) -> (i32, i32) {
    %c0_i32 = arith.constant 0 : i32
    %c0_i32_0 = arith.constant 0 : i32
    %c0_i32_1 = arith.constant 0 : i32
    return %c0_i32, %c0_i32_0 : i32, i32
  }
  func.func @transform_4(%arg0: i32) -> (i32, i32) {
    %c0_i32 = arith.constant 0 : i32
    %c0_i32_0 = arith.constant 0 : i32
    %c0_i32_1 = arith.constant 0 : i32
    return %c0_i32, %c0_i32_0 : i32, i32
  }
  func.func @transform_5(%arg0: i32) -> (i32, i32) {
    %c0_i32 = arith.constant 0 : i32
    %c0_i32_0 = arith.constant 0 : i32
    %c0_i32_1 = arith.constant 0 : i32
    return %c0_i32, %c0_i32_0 : i32, i32
  }
  func.func @transform_6(%arg0: i32) -> (i32, i32) {
    %c0_i32 = arith.constant 0 : i32
    %c0_i32_0 = arith.constant 0 : i32
    %c0_i32_1 = arith.constant 0 : i32
    return %c0_i32, %c0_i32_0 : i32, i32
  }
  func.func @transform_7(%arg0: i32) -> (i32, i32) {
    %c0_i32 = arith.constant 0 : i32
    %c0_i32_0 = arith.constant 0 : i32
    %c0_i32_1 = arith.constant 0 : i32
    return %c0_i32, %c0_i32_0 : i32, i32
  }
  func.func @transform_8(%arg0: i32) -> (i32, i32) {
    %c0_i32 = arith.constant 0 : i32
    %c0_i32_0 = arith.constant 0 : i32
    %c0_i32_1 = arith.constant 0 : i32
    return %c0_i32, %c0_i32_0 : i32, i32
  }
  func.func @transform_9(%arg0: i32) -> (i32, i32) {
    %c0_i32 = arith.constant 0 : i32
    %c0_i32_0 = arith.constant 0 : i32
    %c0_i32_1 = arith.constant 0 : i32
    return %c0_i32, %c0_i32_0 : i32, i32
  }
  func.func @transform_10(%arg0: i32) -> (i32, i32) {
    %c0_i32 = arith.constant 0 : i32
    %c0_i32_0 = arith.constant 0 : i32
    %c0_i32_1 = arith.constant 0 : i32
    return %c0_i32, %c0_i32_0 : i32, i32
  }
  func.func @transform_11(%arg0: i32) -> (i32, i32) {
    %c0_i32 = arith.constant 0 : i32
    %c0_i32_0 = arith.constant 0 : i32
    %c0_i32_1 = arith.constant 0 : i32
    return %c0_i32, %c0_i32_0 : i32, i32
  }
  func.func @transform_12(%arg0: i32) -> (i32, i32) {
    %c0_i32 = arith.constant 0 : i32
    %c0_i32_0 = arith.constant 0 : i32
    %c0_i32_1 = arith.constant 0 : i32
    return %c0_i32, %c0_i32_0 : i32, i32
  }
  func.func @transform_13(%arg0: i32) -> (i32, i32) {
    %c0_i32 = arith.constant 0 : i32
    %c0_i32_0 = arith.constant 0 : i32
    %c0_i32_1 = arith.constant 0 : i32
    return %c0_i32, %c0_i32_0 : i32, i32
  }
  func.func @transform_14(%arg0: i32) -> (i32, i32) {
    %c0_i32 = arith.constant 0 : i32
    %c0_i32_0 = arith.constant 0 : i32
    %c0_i32_1 = arith.constant 0 : i32
    return %c0_i32, %c0_i32_0 : i32, i32
  }
  func.func @transform_15(%arg0: i32) -> (i32, i32) {
    %c0_i32 = arith.constant 0 : i32
    %c0_i32_0 = arith.constant 0 : i32
    %c0_i32_1 = arith.constant 0 : i32
    return %c0_i32, %c0_i32_0 : i32, i32
  }
  func.func @transform_16(%arg0: i32) -> (i32, i32) {
    %c0_i32 = arith.constant 0 : i32
    %c0_i32_0 = arith.constant 0 : i32
    %c0_i32_1 = arith.constant 0 : i32
    return %c0_i32, %c0_i32_0 : i32, i32
  }
  func.func @transform_17(%arg0: i32) -> (i32, i32) {
    %c0_i32 = arith.constant 0 : i32
    %c0_i32_0 = arith.constant 0 : i32
    %c0_i32_1 = arith.constant 0 : i32
    return %c0_i32, %c0_i32_0 : i32, i32
  }
  func.func @transform_18(%arg0: i32) -> (i32, i32) {
    %c0_i32 = arith.constant 0 : i32
    %c0_i32_0 = arith.constant 0 : i32
    %c0_i32_1 = arith.constant 0 : i32
    return %c0_i32, %c0_i32_0 : i32, i32
  }
  func.func @transform_19(%arg0: i32) -> (i32, i32) {
    %c0_i32 = arith.constant 0 : i32
    %c0_i32_0 = arith.constant 0 : i32
    %c0_i32_1 = arith.constant 0 : i32
    return %c0_i32, %c0_i32_0 : i32, i32
  }
  func.func @transform_20(%arg0: i32) -> (i32, i32, i32) {
    %c0_i32 = arith.constant 0 : i32
    %c0_i32_0 = arith.constant 0 : i32
    %c0_i32_1 = arith.constant 0 : i32
    return %arg0, %c0_i32, %c0_i32_0 : i32, i32, i32
  }
}

</mosaic_0001>

<bundles_post_ra>
// kernel: tpu_custom_call.1
= control target key start
LH: loop header
LB: loop body
LE: loop exit
PB: predicated region body
PF: predicated region fallthrough
CT: control target
= control target key end

     0   :  { %6 = vsyncpa [#allocation3], 0  ;;  %s340_s0 = inlined_call_operand.hbm [shape: f32[8,128], index: 0, kind: input, shape index: {}]   ;;  %s341_s1 = inlined_call_operand.hbm [shape: f32[8,128], index: 1, kind: output, shape index: {}]  }
   0x1   :  { %7 = vsyncpa [#allocation4], 0  ;;  %s261_s6 = smov 0  }
   0x2 LB: > { %s144_s7 = sadd.s32 4294967295, %s247_s6   ;;  %p145_p0 = scmp.ge.s32.totalorder %s247_s6, 1  ;;  %s247_s6 = sphi %s261_s6, %s13_s6  }
   0x3   : > { %p60_p1 = scmp.lt.s32.totalorder %s247_s6, 3  ;;  %p275_p3 = scmp.eq.s32.totalorder %s144_s7, 0 }
   0x4   : > { %s249_s10 = smov [#allocation2]   ;;  %s179_s15 = scalar_lea.hbm %s340_s0, 128 }
   0x5   : > { %p269_p2 = pnand %p145_p0, %p60_p1  ;;  %s73_s11 = sshll.u32 %s249_s10, 4  ;;  %s74_s11 = int_to_ptr.vmem [resolvable:$true] %s73_s11 }
   0x6   : > { %s346_s9 = scalar_select %p275_p3, 1, 0 }
   0x7   : > { %s345_s8 = scalar_select %p269_p2, 1, 0 }
   0x8   : > { %p161_p4 = pneg %p269_p2  ;;  %p180_p6 = scmp.ne.s32.totalorder %s340_s0, %s179_s15 }
   0x9   : > { %p186_p10 = scmp.lt.u32.totalorder %s179_s15, %s340_s0 }
   0xa   : > { %p283_p5 = pnand %p275_p3, %p161_p4 }
   0xc   : > { %p181_p7 = pneg %p283_p5 }
   0xe   : > { %p182_p8 = pnand %p181_p7, %p180_p6 }
  0x10   : > { %p183_p9 = pneg %p182_p8 }
  0x12   : > { %p188_p11 = pnand %p186_p10, %p183_p9 }
  0x14   : > { %191 = shalt.err (!%p188_p11)
}
  0x15   : > { %s192_s20 = scalar_lea.vmem %s74_s11, 128  ;;  %p200_p1 = scmp.lt.s32.totalorder %s74_s11, %s74_s11 }
  0x16   : > { %p193_p12 = scmp.ne.s32.totalorder %s74_s11, %s192_s20  ;;  %p201_p4 = scmp.lt.s32.totalorder %s192_s20, %s192_s20 }
  0x18   : > { %p195_p13 = pnand %p193_p12, %p181_p7  ;;  %p202_p3 = por %p201_p4, %p200_p1 }
  0x1a   : > { %p196_p0 = pneg %p195_p13 }
  0x1c   : > { %p203_p2 = pnand %p202_p3, %p196_p0 }
  0x1e   : > { %206 = shalt.err (!%p203_p2)
}
  0x1f   : > { %164 = dma.hbm_to_vmem [thread:$0]  (!%p283_p5), %s340_s0, 128, %s74_s11, [#allocation3]  }
  0x20   : > { %p348_p6 = scmp.ne.s32.totalorder %s345_s8, 0 }
  0x21   : > { %p349_p8 = scmp.ne.s32.totalorder (!%p348_p6), %s346_s9, 0 }
  0x22   : > { %86 = sbr.rel (%p348_p6) target bundleno = 67 (0x43), region = 24 }
  0x29   : > { %238 = dma.done.wait (%p349_p8), [#allocation3], 128  }
  0x2a   : > { %240 = vsyncadd (%p349_p8), [#allocation3], 4294967168  ;;  %s250_s23 = smov [#allocation5]   ;;  %p311_p2 = scmp.eq.s32.totalorder %s144_s7, 1  ;;  %v96_v0 = vld [vmem:[#allocation2] sm:$0xff] }
  0x2b   : > { %s105_s24 = sshll.u32 %s250_s23, 4  ;;  %97 = vst [vmem:[#allocation5] sm:$0xff] %v96_v0  ;;  %s106_s24 = int_to_ptr.vmem [resolvable:$true] %s105_s24 }
  0x2c   : > { %s207_s26 = scalar_lea.vmem %s106_s24, 128  ;;  %p214_p9 = scmp.lt.s32.totalorder %s106_s24, %s106_s24 }
  0x2d   : > { %p208_p3 = scmp.ne.s32.totalorder %s106_s24, %s207_s26  ;;  %p215_p10 = scmp.lt.s32.totalorder %s207_s26, %s207_s26 }
  0x2f   : > { %p209_p5 = pnand %p208_p3, %p311_p2  ;;  %p216_p11 = por %p215_p10, %p214_p9 }
  0x31   : > { %p210_p7 = pneg %p209_p5 }
  0x33   : > { %p217_p12 = pnand %p216_p11, %p210_p7 }
  0x35   : > { %220 = shalt.err (!%p217_p12)
}
  0x36   : > { %s221_s29 = scalar_lea.hbm %s341_s1, 128 }
  0x37   : > { %p222_p13 = scmp.ne.s32.totalorder %s341_s1, %s221_s29  ;;  %p227_p4 = scmp.lt.u32.totalorder %s221_s29, %s341_s1 }
  0x39   : > { %p223_p0 = pnand %p222_p13, %p311_p2 }
  0x3b   : > { %p224_p1 = pneg %p223_p0 }
  0x3d   : > { %p229_p6 = pnand %p227_p4, %p224_p1 }
  0x3f   : > { %232 = shalt.err (!%p229_p6)
}
  0x40   : > { %158 = dma.vmem_to_hbm [thread:$0]  (%p311_p2), %s106_s24, 128, %s341_s1, [#allocation4]  }
  0x41   : > { %242 = dma.done.wait (%p311_p2), [#allocation4], 128  }
  0x42   : > { %244 = vsyncadd (%p311_p2), [#allocation4], 4294967168 }
  0x43 PF: > { %s13_s6 = sadd.s32 1, %s247_s6  }
  0x44   : > { %p10_p8 = scmp.ge.s32.totalorder %s13_s6, 4  }
  0x46   :  { %12 = sbr.rel (!%p10_p8) target bundleno = 2 (0x2), region = 53 }
  0x4d   :  { %118 = vsyncpa [#allocation3], 1 }
  0x4e   :  { %120 = vsyncpa [#allocation3 + $0x1], 1 }
  0x4f   :  { %121 = vsyncpa [#allocation4], 1 }
  0x50   :  { %123 = vsyncpa [#allocation4 + $0x1], 1 }

// kernel: tpu_custom_call.1
= control target key start
LH: loop header
LB: loop body
LE: loop exit
PB: predicated region body
PF: predicated region fallthrough
CT: control target
= control target key end

     0   :  { %s2520_s0 = inlined_call_operand.vmem [shape: f32[2,8,32], index: 0, kind: input, shape index: {}]   ;;  %s2521_s1 = inlined_call_operand.vmem [shape: f32[2,1,32], index: 1, kind: input, shape index: {}]   ;;  %s2522_s2 = inlined_call_operand.vmem [shape: f32[1,32], index: 2, kind: input, shape index: {}]   ;;  %s2523_s3 = inlined_call_operand.vmem [shape: f32[1,32], index: 3, kind: input, shape index: {}]   ;;  %s2524_s4 = inlined_call_operand.vmem [shape: f32[32,32], index: 4, kind: input, shape index: {}]   ;;  %s2525_s5 = inlined_call_operand.vmem [shape: f32[32,32], index: 5, kind: input, shape index: {}]   ;;  %s2526_s6 = inlined_call_operand.vmem [shape: f32[32,32], index: 6, kind: input, shape index: {}]   ;;  %s2527_s7 = inlined_call_operand.vmem [shape: f32[32,32], index: 7, kind: input, shape index: {}]   ;;  %s2528_s8 = inlined_call_operand.vmem [shape: f32[1,32], index: 8, kind: input, shape index: {}]   ;;  %s2529_s9 = inlined_call_operand.vmem [shape: f32[1,32], index: 9, kind: input, shape index: {}]   ;;  %s2530_s10 = inlined_call_operand.vmem [shape: f32[32,4], index: 10, kind: input, shape index: {}]   ;;  %s2531_s11 = inlined_call_operand.vmem [shape: f32[4,32], index: 11, kind: input, shape index: {}]   ;;  %s2532_s12 = inlined_call_operand.vmem [shape: f32[1,32], index: 12, kind: input, shape index: {}]   ;;  %s2533_s13 = inlined_call_operand.vmem [shape: f32[1,32], index: 13, kind: input, shape index: {}]   ;;  %s2534_s14 = inlined_call_operand.vmem [shape: f32[32,128], index: 14, kind: input, shape index: {}]   ;;  %s2535_s15 = inlined_call_operand.vmem [shape: f32[1,128], index: 15, kind: input, shape index: {}]   ;;  %s2536_s16 = inlined_call_operand.vmem [shape: f32[128,32], index: 16, kind: input, shape index: {}]   ;;  %s2537_s17 = inlined_call_operand.vmem [shape: f32[1,32], index: 17, kind: input, shape index: {}]   ;;  %s2538_s18 = inlined_call_operand.vmem [shape: f32[1,32], index: 18, kind: input, shape index: {}]   ;;  %s2539_s19 = inlined_call_operand.vmem [shape: f32[1,32], index: 19, kind: input, shape index: {}]   ;;  %s2540_s20 = inlined_call_operand.hbm [shape: f32[2,1,32], index: 20, kind: output, shape index: {}]  }
   0x1   :  { %2544 = sst [smem:[#allocation5_spill]] %s2520_s0 }
   0x2   :  { %2545 = sst [smem:[#allocation6_spill]] %s2521_s1 }
   0x3   :  { %2546 = sst [smem:[#allocation7_spill]] %s2522_s2 }
   0x4   :  { %2547 = sst [smem:[#allocation8_spill]] %s2523_s3 }
   0x5   :  { %2548 = sst [smem:[#allocation9_spill]] %s2524_s4 }
   0x6   :  { %s2549_s23 = sld [smem:[#allocation6_spill]]  ;;  %v122_v2 = vlaneseq  ;;  %v2054_v3 = vmov 1966171168   ;;  %vm72_vm0 = vcmask 261120   ;;  %s2550_s26 = sld [smem:[#allocation5_spill]] }
   0x7   :  { %v120_v4 = vunpack.c.l.s4 %v2054_v3 }
   0xc   :  { %v2169_v0 = vld [vmem:[%s2549_s23] sm:$0x1]  ;;  %v2174_v1 = vld [vmem:[%s2549_s23 + $0x1] sm:$0x1]  ;;  %v67_v5 = vld [vmem:[%s2550_s26 + $0x8] sm:$0xff] }
   0xd   :  { %25 = vsyncpa [#allocation3], 0  ;;  %v123_v6 = vshrl.u32 %v122_v2, 7  ;;  %v76_v7 = vsel %vm72_vm0, %v67_v5, 0.0  ;;  %v118_v8 = vcombine.low %v2169_v0, %v2174_v1  ;;  %v121_v9 = vunpack.c.0.s8 %v120_v4  ;;  %v66_v13 = vld [vmem:[%s2550_s26] sm:$0xff]  ;;  %s2551_s30 = sld [smem:[#allocation9_spill]] }
   0xe   :  { %77 = vadd.xlane.f32.xlu1 %v76_v7  ;;  %vm134_vm1 = vcmask 254976   ;;  %v73_v15 = vsel %vm72_vm0, %v66_v13, 0.0  ;;  %v2055_v45 = vmov 0.0|0.0   ;;  %vm2056_vm2 = vmmov 0   ;;  %s2552_s3 = sld [smem:[#allocation7_spill]]  ;;  %s2553_s28 = sld [smem:[#allocation8_spill]] }
   0xf   :  { %v2182_v10 = vsub.s32 %v121_v9, %v123_v6  ;;  %v2191_v16 = vsub.s32 0, %v123_v6  ;;  %v2193_v17 = vsub.s32 1, %v123_v6  ;;  %1921 = vmatprep.subr.bf16.mxu0 %v2055_v45  ;;  %v2057_v46 = vmov 0.0  }
  0x10   :  { %1780 = vmatprep.mubr.msk.f32.mxu0 %vm2056_vm2, %v2057_v46  ;;  %vm905_vm3 = vcmask 1043456   ;;  %vm836_vm4 = vcmask 31744   ;;  %vm874_vm5 = vcmask 1041409   ;;  %vm1652_vm6 = vcmask 253952  }
  0x11   :  { %v125_v11 = vrot.slane %v118_v8, %v2182_v10 }
  0x13   :  { %v132_v12 = vrot.slane %v125_v11, %v2182_v10  ;;  %v243_v40 = vld [vmem:[%s2551_s30] sm:$0xff]  ;;  %v244_v41 = vld [vmem:[%s2551_s30 + $0x8] sm:$0xff]  ;;  %v245_v43 = vld [vmem:[%s2551_s30 + $0x10] sm:$0xff] }
  0x14   :  { %v1922_v42 = vpack.c.bf16 %v244_v41, %v243_v40  ;;  %v246_v44 = vld [vmem:[%s2551_s30 + $0x18] sm:$0xff]  ;;  %v2232_v51 = vld [vmem:[%s2552_s3] ss:$0 sm:$0xff]  ;;  %v642_v41 = vld [vmem:[%s2530_s10 + $0x8] sm:$0xff] }
  0x15   :  { %v135_v14 = vsel %vm134_vm1, %v132_v12, 0.0  ;;  %v1925_v47 = vpack.c.bf16 %v246_v44, %v245_v43  ;;  %v2237_v52 = vld [vmem:[%s2553_s28] ss:$0 sm:$0xff]  ;;  %v197_v53 = vrot.slane %v2232_v51, %v2182_v10  ;;  %v643_v43 = vld [vmem:[%s2530_s10 + $0x10] sm:$0xff]  ;;  %v644_v44 = vld [vmem:[%s2530_s10 + $0x18] sm:$0xff] }
  0x16   :  { %136 = vadd.xlane.f32.xlu0 %v135_v14  ;;  %1923 = vmatpush3.bf16.msra.mxu0 %v1922_v42  ;;  %v223_v54 = vrot.slane %v2237_v52, %v2182_v10 }
  0x17   :  { %1924 = vmatprep.subr.bf16.mxu0 %v2055_v45  ;;  %v198_v55 = vcombine.high %v197_v53, %v197_v53  ;;  %v205_v59 = vrot.slane %v197_v53, %v2182_v10 }
  0x18   :  { %v224_v57 = vcombine.high %v223_v54, %v223_v54  ;;  %v231_v4 = vrot.slane %v223_v54, %v2182_v10 }
  0x19   :  { %v212_v63 = vrot.slane %v198_v55, %v2182_v10 }
  0x1a   :  { %74 = vadd.xlane.f32.xlu0 %v73_v15  ;;  %1926 = vmatpush3.bf16.msra.mxu0 %v1925_v47  ;;  %v337_v15 = vld [vmem:[%s2525_s5] sm:$0xff]  ;;  %v1959_v47 = vpack.c.bf16 %v644_v44, %v643_v43 }
  0x1b   :  { %1927 = vmatprep.subr.bf16.mxu0 %v2055_v45 }
  0x9b   :  { %v78_v20 = vpop.xlane.xlu1 %77 }
  0x9c   :  { %v81_v27 = vmul.f32 0.03125, %v78_v20 }
  0x9e   :  { %v2201_v31 = vsub.f32 %v67_v5, %v81_v27  ;;  %v238_v5 = vrot.slane %v224_v57, %v2182_v10  ;;  %v412_v27 = vld [vmem:[%s2526_s6 + $0x8] sm:$0xff] }
  0xa0   :  { %v85_v37 = vmul.f32 %v2201_v31, %v2201_v31 }
  0xa2   :  { %v89_v39 = vsel %vm72_vm0, %v85_v37, 0.0 }
  0xa3   :  { %v137_v18 = vpop.xlane.xlu0 %136 }
  0xa4   :  { %v138_v19 = vmul.f32 0.03125, %v137_v18  ;;  %v338_v18 = vld [vmem:[%s2525_s5 + $0x8] sm:$0xff] }
  0xa6   :  { %v143_v21 = vrot.slane %v138_v19, %v2191_v16  ;;  %v147_v22 = vrot.slane %v138_v19, %v2193_v17 }
  0xa7   :  { %v75_v23 = vpop.xlane.xlu0 %74 }
  0xa8   :  { %v150_v24 = vsub.f32 %v2169_v0, %v143_v21  ;;  %v151_v25 = vsub.f32 %v2174_v1, %v147_v22  ;;  %v80_v26 = vmul.f32 0.03125, %v75_v23  ;;  %v1928_v21 = vpack.c.bf16 %v338_v18, %v337_v15  ;;  %v339_v23 = vld [vmem:[%s2525_s5 + $0x10] sm:$0xff] }
  0xaa   :  { %v152_v28 = vmul.f32 %v150_v24, %v150_v24  ;;  %v153_v29 = vmul.f32 %v151_v25, %v151_v25  ;;  %v2199_v30 = vsub.f32 %v66_v13, %v80_v26  ;;  %v411_v26 = vld [vmem:[%s2526_s6] sm:$0xff] }
  0xac   :  { %v84_v32 = vmul.f32 %v2199_v30, %v2199_v30  ;;  %v156_v33 = vcombine.low %v152_v28, %v153_v29  ;;  %v1934_v29 = vpack.c.bf16 %v412_v27, %v411_v26 }
  0xae   :  { %v86_v34 = vsel %vm72_vm0, %v84_v32, 0.0  ;;  %v163_v35 = vrot.slane %v156_v33, %v2182_v10  ;;  %v413_v32 = vld [vmem:[%s2526_s6 + $0x10] sm:$0xff]  ;;  %v414_v33 = vld [vmem:[%s2526_s6 + $0x18] sm:$0xff] }
  0xaf   :  { %87 = vadd.xlane.f32.xlu0 %v86_v34 }
  0xb0   :  { %v170_v36 = vrot.slane %v163_v35, %v2182_v10  ;;  %v1937_v35 = vpack.c.bf16 %v414_v33, %v413_v32 }
  0xb2   :  { %v172_v38 = vsel %vm134_vm1, %v170_v36, 0.0 }
  0xb3   :  { %173 = vadd.xlane.f32.xlu1 %v172_v38 }
  0xb7   :  { %90 = vadd.xlane.f32.xlu1 %v89_v39 }
 0x13c   :  { %v88_v56 = vpop.xlane.xlu0 %87 }
 0x13d   :  { %v92_v60 = vmul.f32 0.03125, %v88_v56 }
 0x13f   :  { %v94_v6 = vadd.f32 1e-05, %v92_v60 }
 0x140   :  { %v174_v48 = vpop.xlane.xlu1 %173 }
 0x141   :  { %v175_v49 = vmul.f32 0.03125, %v174_v48 }
 0x143   :  { %v176_v50 = vadd.f32 1e-05, %v175_v49 }
 0x144   :  { %v91_v7 = vpop.xlane.xlu1 %90 }
 0x145   :  { %2012 = vrsqrt.f32 %v176_v50  ;;  %v93_v13 = vmul.f32 0.03125, %v91_v7 }
 0x146   :  { %2014 = vrsqrt.f32 %v94_v6  ;;  %v645_v6 = vld [vmem:[%s2531_s11] sm:$0xf] }
 0x147   :  { %v95_v20 = vadd.f32 1e-05, %v93_v13 }
 0x149   :  { %2016 = vrsqrt.f32 %v95_v20 }
 0x14f   :  { %v2013_v58 = vpop.eup %2012 }
 0x150   :  { %v182_v61 = vrot.slane %v2013_v58, %v2191_v16  ;;  %v186_v62 = vrot.slane %v2013_v58, %v2193_v17  ;;  %v2015_v28 = vpop.eup %2014 }
 0x151   :  { %v98_v34 = vmul.f32 %v2015_v28, %v2199_v30 }
 0x152   :  { %v189_v2 = vmul.f32 %v182_v61, %v150_v24  ;;  %v190_v3 = vmul.f32 %v186_v62, %v151_v25  ;;  %v340_v24 = vld [vmem:[%s2525_s5 + $0x18] sm:$0xff] }
 0x153   :  { %v1931_v25 = vpack.c.bf16 %v340_v24, %v339_v23  ;;  %v2017_v36 = vpop.eup %2016  ;;  %v106_v37 = vmul.f32 %v2232_v51, %v98_v34 }
 0x154   :  { %v215_v8 = vmul.f32 %v205_v59, %v189_v2  ;;  %v216_v9 = vmul.f32 %v212_v63, %v190_v3  ;;  %v99_v38 = vmul.f32 %v2017_v36, %v2201_v31  ;;  %v641_v31 = vld [vmem:[%s2530_s10] sm:$0xff] }
 0x155   :  { %v114_v39 = vadd.f32 %v2237_v52, %v106_v37  ;;  %v1955_v42 = vpack.c.bf16 %v642_v41, %v641_v31 }
 0x156   :  { %v241_v11 = vadd.f32 %v231_v4, %v215_v8  ;;  %v242_v12 = vadd.f32 %v238_v5, %v216_v9  ;;  %v107_v30 = vmul.f32 %v2232_v51, %v99_v38 }
 0x157   :  { %1956 = vmatprep.subr.bf16.mxu1 %v1955_v42 }
 0x158   :  { %v249_v14 = vcombine.low %v241_v11, %v242_v12  ;;  %v115_v40 = vadd.f32 %v2237_v52, %v107_v30  ;;  %1958 = vmatpush3.bf16.msra.mxu1 %v1955_v42 }
 0x159   :  { %1960 = vmatprep.subr.bf16.mxu1 %v1959_v47 }
 0x15a   :  { %v256_v19 = vrot.slane %v249_v14, %v2182_v10 }
 0x15c   :  { %v263_v22 = vrot.slane %v256_v19, %v2182_v10  ;;  %1962 = vmatpush3.bf16.msra.mxu1 %v1959_v47 }
 0x15d   :  { %1849 = vmatprep.subr.msk.mxu1 %vm905_vm3, %v645_v6 }
 0x15e   :  { %1781 = vmatmul.mubr.msk.f32.vlgmr.msra.gmra.mrb[0].mxu0 %vm72_vm0, %v263_v22 }
 0x15f   :  { %1929 = vmatpush3.bf16.msra.mxu0 %v1928_v21  ;;  %1791 = vmatprep.mubr.msk.f32.mxu0 %vm2056_vm2, %v2057_v46 }
 0x160   :  { %1930 = vmatprep.subr.bf16.mxu0 %v2055_v45 }
 0x163   :  { %1932 = vmatpush3.bf16.msra.mxu0 %v1931_v25 }
 0x164   :  { %1933 = vmatprep.subr.bf16.mxu0 %v2055_v45 }
 0x166   :  { %1792 = vmatmul.mubr.msk.f32.vlgmr.msra.gmra.mrb[2].mxu0 %vm72_vm0, %v263_v22 }
 0x167   :  { %1935 = vmatpush3.bf16.msra.mxu0 %v1934_v29  ;;  %1802 = vmatprep.mubr.msk.f32.mxu0 %vm2056_vm2, %v2057_v46 }
 0x168   :  { %1936 = vmatprep.subr.bf16.mxu0 %v2055_v45 }
 0x16b   :  { %1938 = vmatpush3.bf16.msra.mxu0 %v1937_v35 }
 0x16c   :  { %1940 = vmatprep.subr.bf16.mxu0 %v1928_v21 }
 0x16e   :  { %1803 = vmatmul.mubr.msk.f32.vlgmr.msra.gmra.mrb[4].mxu0 %vm72_vm0, %v263_v22 }
 0x16f   :  { %1942 = vmatpush3.bf16.msra.mxu0 %v1928_v21  ;;  %1813 = vmatprep.mubr.msk.f32.mxu0 %vm72_vm0, %v114_v39 }
 0x170   :  { %1944 = vmatprep.subr.bf16.mxu0 %v1931_v25 }
 0x173   :  { %1946 = vmatpush3.bf16.msra.mxu0 %v1931_v25 }
 0x174   :  { %1948 = vmatprep.subr.bf16.mxu0 %v1934_v29 }
 0x176   :  { %1814 = vmatmul.mubr.msk.f32.vlgmr.msra.gmra.mrb[6].mxu0 %vm72_vm0, %v115_v40 }
 0x177   :  { %1950 = vmatpush3.bf16.msra.mxu0 %v1934_v29  ;;  %1824 = vmatprep.mubr.msk.f32.mxu0 %vm72_vm0, %v114_v39 }
 0x178   :  { %1952 = vmatprep.subr.bf16.mxu0 %v1937_v35 }
 0x17b   :  { %1954 = vmatpush3.bf16.msra.mxu0 %v1937_v35 }
 0x17c   :  { %1963 = vmatprep.subr.bf16.mxu0 %v2055_v45 }
 0x17e   :  { %1825 = vmatmul.mubr.msk.f32.vlgmr.msra.gmra.mrb[8].mxu0 %vm72_vm0, %v115_v40 }
 0x17f   :  { %1846 = vmatprep.mubr.msk.f32.mxu0 %vm2056_vm2, %v2057_v46  ;;  %1965 = vmatpush3.bf16.msra.mxu0 %v1955_v42 }
 0x180   :  { %1966 = vmatprep.subr.bf16.mxu0 %v2055_v45 }
 0x183   :  { %1968 = vmatpush3.bf16.msra.mxu0 %v1959_v47 }
 0x184   :  { %1859 = vmatprep.subr.mxu0 %v2057_v46 }
 0x231   :  { %v332_v48 = vpop.f32.mrb[0].mxu0 }
 0x232   :  { %v1782_v49 = vpop.f32.mrb[1].mxu0  ;;  %v336_v50 = vmul.f32 0.35355338, %v332_v48 }
 0x234   :  { %v653_v54 = vrot.slane %v336_v50, %v2182_v10 }
 0x236   :  { %v654_v55 = vcombine.high %v653_v54, %v653_v54  ;;  %v661_v59 = vrot.slane %v653_v54, %v2182_v10 }
 0x238   :  { %v668_v58 = vrot.slane %v654_v55, %v2182_v10  ;;  %v672_v62 = vrot.slane %v661_v59, %v2191_v16 }
 0x239   :  { %v407_v51 = vpop.f32.mrb[2].mxu0 }
 0x23a   :  { %v762_v52 = vmul.f32 %v407_v51, %v336_v50  ;;  %v1793_v53 = vpop.f32.mrb[3].mxu0  ;;  %v676_v60 = vrot.slane %v668_v58, %v2191_v16 }
 0x23c   :  { %1847 = vmatmul.mubr.msk.f32.vlgmr.msra.gmra.mrb[10].mxu0 %vm72_vm0, %v762_v52 }
 0x23d   :  { %1861 = vmatprep.mubr.msk.f32.mxu0 %vm2056_vm2, %v2057_v46  ;;  %1860 = vmatpush3.msk.msra.mxu0 %vm905_vm3, %v645_v6 }
 0x23e   :  { %1975 = vmatprep.subr.bf16.mxu0 %v2055_v45 }
 0x241   :  { %v2316_v56 = vpop.f32.mrb[4].mxu0 }
 0x242   :  { %v1804_v57 = vpop.f32.mrb[5].mxu0 }
 0x249   :  { %v1815_v61 = vpop.f32.mrb[6].mxu0 }
 0x24a   :  { %v680_v63 = vmul.f32 %v1815_v61, %v676_v60  ;;  %v557_v2 = vpop.f32.mrb[7].mxu0 }
 0x24b   :  { %v679_v3 = vmul.f32 %v672_v62, %v557_v2  ;;  %v1163_v2 = vld [vmem:[%s2527_s7 + $0x8] sm:$0xff] }
 0x24d   :  { %1835 = vmatprep.mubr.msk.f32.mxu1 %vm72_vm0, %v679_v3 }
 0x24e   :  { %1836 = vmatmul.mubr.msk.f32.vlgmr.msra.gmra.mrb[0].mxu1 %vm72_vm0, %v680_v63  ;;  %v1162_v63 = vld [vmem:[%s2527_s7] sm:$0xff] }
 0x24f   :  { %1850 = vmatpush3.msk.msra.mxu1 %vm905_vm3, %v645_v6  ;;  %v1970_v3 = vpack.c.bf16 %v1163_v2, %v1162_v63 }
 0x250   :  { %1854 = vmatprep.subr.mxu1 %v2057_v46 }
 0x251   :  { %v2324_v4 = vpop.f32.mrb[8].mxu0 }
 0x252   :  { %v2326_v5 = vpop.f32.mrb[9].mxu0 }
 0x30f   :  { %v832_v7 = vpop.f32.mrb[10].mxu0 }
 0x310   :  { %v1848_v8 = vpop.f32.mrb[11].mxu0  ;;  %v852_v26 = vrot.slane %v832_v7, 1 }
 0x321   :  { %v1837_v9 = vpop.f32.mrb[0].mxu1 }
 0x322   :  { %v844_v11 = vsel %vm836_vm4, %v1837_v9, -inf  ;;  %v753_v12 = vpop.f32.mrb[1].mxu1 }
 0x323   :  { %v845_v13 = vrot.slane %v844_v11, 4  ;;  %v837_v14 = vsel %vm836_vm4, %v753_v12, -inf }
 0x324   :  { %v838_v15 = vrot.slane %v837_v14, 4 }
 0x325   :  { %v846_v18 = vmax.f32 %v844_v11, %v845_v13 }
 0x326   :  { %v839_v19 = vmax.f32 %v837_v14, %v838_v15 }
 0x327   :  { %v847_v20 = vrot.slane %v846_v18, 2 }
 0x328   :  { %v840_v21 = vrot.slane %v839_v19, 2 }
 0x329   :  { %v848_v22 = vmax.f32 %v846_v18, %v847_v20 }
 0x32a   :  { %v841_v23 = vmax.f32 %v839_v19, %v840_v21 }
 0x32b   :  { %v849_v24 = vrot.slane %v848_v22, 1 }
 0x32c   :  { %v842_v25 = vrot.slane %v841_v23, 1 }
 0x32d   :  { %v850_v27 = vmax.f32 %v848_v22, %v849_v24 }
 0x32e   :  { %v843_v28 = vmax.f32 %v841_v23, %v842_v25 }
 0x32f   :  { %v856_v29 = vmax.f32 %v850_v27, %v852_v26 }
 0x330   :  { %v855_v32 = vmax.f32 %v843_v28, %v832_v7 }
 0x331   :  { %v864_v33 = vrot.slane %v856_v29, %v2191_v16  ;;  %v873_v34 = vrot.slane %v856_v29, 7 }
 0x332   :  { %v860_v35 = vrot.slane %v855_v32, %v2191_v16 }
 0x333   :  { %v866_v36 = vsub.f32 %v1837_v9, %v864_v33  ;;  %v875_v37 = vsel %vm874_vm5, %v873_v34, %v855_v32 }
 0x334   :  { %v865_v38 = vsub.f32 %v753_v12, %v860_v35  ;;  %v877_v39 = vsub.f32 %v832_v7, %v875_v37  ;;  %v1165_v7 = vld [vmem:[%s2527_s7 + $0x18] sm:$0xff] }
 0x335   :  { %v869_v30 = vmul.f32 1.442695, %v866_v36 }
 0x336   :  { %v867_v40 = vmul.f32 1.442695, %v865_v38  ;;  %v878_v31 = vmul.f32 1.442695, %v877_v39 }
 0x337   :  { %2018 = vpow2.f32 %v869_v30  ;;  %v1691_v30 = vld [vmem:[%s2528_s8] ss:$0 sm:$0xff] }
 0x338   :  { %2020 = vpow2.f32 %v867_v40 }
 0x339   :  { %2022 = vpow2.f32 %v878_v31  ;;  %v1693_v31 = vld [vmem:[%s2538_s18] ss:$0 sm:$0xff] }
 0x341   :  { %v2019_v41 = vpop.eup %2018 }
 0x342   :  { %v2021_v42 = vpop.eup %2020  ;;  %v887_v43 = vsel %vm836_vm4, %v2019_v41, 0.0 }
 0x343   :  { %v888_v44 = vrot.slane %v887_v43, 4  ;;  %v880_v47 = vsel %vm836_vm4, %v2021_v42, 0.0  ;;  %1851 = vmatprep.mubr.msk.f32.mxu1 %vm836_vm4, %v2021_v42  ;;  %v2023_v51 = vpop.eup %2022 }
 0x344   :  { %v881_v48 = vrot.slane %v880_v47, 4  ;;  %1852 = vmatmul.mubr.msk.f32.vlgmr.msra.gmra.mrb[2].mxu1 %vm836_vm4, %v2019_v41 }
 0x345   :  { %v889_v49 = vadd.f32 %v888_v44, %v887_v43  ;;  %1855 = vmatpush3.msk.msra.mxu1 %vm905_vm3, %v645_v6  ;;  %1856 = vmatprep.mubr.msk.f32.mxu1 %vm2056_vm2, %v2057_v46  ;;  %v1164_v6 = vld [vmem:[%s2527_s7 + $0x10] sm:$0xff] }
 0x346   :  { %v882_v50 = vadd.f32 %v881_v48, %v880_v47  ;;  %1969 = vmatprep.subr.bf16.mxu1 %v2055_v45  ;;  %v1973_v8 = vpack.c.bf16 %v1165_v7, %v1164_v6  ;;  %v1419_v6 = vld [vmem:[%s2534_s14] sm:$0xff]  ;;  %v1420_v7 = vld [vmem:[%s2534_s14 + $0x8] sm:$0xff] }
 0x347   :  { %v890_v52 = vrot.slane %v889_v49, 2 }
 0x348   :  { %v883_v53 = vrot.slane %v882_v50, 2  ;;  %1857 = vmatmul.mubr.msk.f32.vlgmr.msra.gmra.mrb[4].mxu1 %vm836_vm4, %v2023_v51 }
 0x349   :  { %v891_v54 = vadd.f32 %v890_v52, %v889_v49  ;;  %1872 = vmatprep.mubr.msk.f32.mxu1 %vm2056_vm2, %v2057_v46  ;;  %1971 = vmatpush3.bf16.msra.mxu1 %v1970_v3 }
 0x34a   :  { %v884_v55 = vadd.f32 %v883_v53, %v882_v50  ;;  %1972 = vmatprep.subr.bf16.mxu1 %v2055_v45 }
 0x34b   :  { %v892_v57 = vrot.slane %v891_v54, 1 }
 0x34c   :  { %v885_v58 = vrot.slane %v884_v55, 1 }
 0x34d   :  { %v893_v59 = vadd.f32 %v892_v57, %v891_v54  ;;  %1974 = vmatpush3.bf16.msra.mxu1 %v1973_v8  ;;  %v1976_v8 = vpack.c.bf16 %v1420_v7, %v1419_v6 }
 0x34e   :  { %v886_v60 = vadd.f32 %v885_v58, %v884_v55  ;;  %1981 = vmatprep.subr.bf16.mxu1 %v2055_v45 }
 0x350   :  { %v896_v61 = vsel %vm874_vm5, %v893_v59, %v886_v60 }
 0x351   :  { %v898_v62 = vadd.f32 %v2023_v51, %v896_v61 }
 0x353   :  { %1862 = vmatmul.mubr.msk.f32.vlgmr.msra.gmra.mrb[12].mxu0 %vm836_vm4, %v898_v62 }
 0x354   :  { %1883 = vmatprep.mubr.msk.f32.mxu0 %vm2056_vm2, %v2057_v46  ;;  %1977 = vmatpush3.bf16.msra.mxu0 %v1976_v8 }
 0x355   :  { %1978 = vmatprep.subr.bf16.mxu0 %v2055_v45 }
 0x417   :  { %v1853_v9 = vpop.f32.mrb[2].mxu1 }
 0x418   :  { %v1132_v11 = vmul.f32 %v1853_v9, %v2324_v4  ;;  %v975_v12 = vpop.f32.mrb[3].mxu1  ;;  %v1421_v9 = vld [vmem:[%s2534_s14 + $0x10] sm:$0xff] }
 0x419   :  { %v1131_v13 = vmul.f32 %v975_v12, %v2326_v5 }
 0x41a   :  { %v1140_v14 = vsel %vm72_vm0, %v1132_v11, 0.0  ;;  %v1422_v11 = vld [vmem:[%s2534_s14 + $0x18] sm:$0xff] }
 0x41b   :  { %v1141_v15 = vrot.slane %v1140_v14, 4  ;;  %v1133_v18 = vsel %vm72_vm0, %v1131_v13, 0.0  ;;  %v1053_v19 = vpop.f32.mrb[4].mxu1  ;;  %v1979_v12 = vpack.c.bf16 %v1422_v11, %v1421_v9  ;;  %v1524_v13 = vld [vmem:[%s2536_s16] sm:$0xff] }
 0x41c   :  { %v1134_v20 = vrot.slane %v1133_v18, 4  ;;  %v1130_v21 = vmul.f32 %v1053_v19, %v2316_v56  ;;  %v1858_v22 = vpop.f32.mrb[5].mxu1  ;;  %v1690_v56 = vld [vmem:[%s2529_s9] ss:$0 sm:$0xff]  ;;  %v1527_v19 = vld [vmem:[%s2536_s16 + $0x18] sm:$0xff] }
 0x41d   :  { %v1142_v23 = vadd.f32 %v1141_v15, %v1140_v14  ;;  %1980 = vmatpush3.bf16.msra.mxu0 %v1979_v12  ;;  %v1525_v14 = vld [vmem:[%s2536_s16 + $0x8] sm:$0xff]  ;;  %v1526_v15 = vld [vmem:[%s2536_s16 + $0x10] sm:$0xff]  ;;  %v1698_v9 = vld [vmem:[%s2537_s17] ss:$0 sm:$0xff] }
 0x41e   :  { %v1135_v24 = vadd.f32 %v1134_v20, %v1133_v18  ;;  %v1982_v18 = vpack.c.bf16 %v1525_v14, %v1524_v13  ;;  %v1985_v20 = vpack.c.bf16 %v1527_v19, %v1526_v15  ;;  %v1529_v22 = vld [vmem:[%s2536_s16 + $0x28] sm:$0xff]  ;;  %v1699_v12 = vld [vmem:[%s2539_s19] ss:$0 sm:$0xff] }
 0x41f   :  { %v1143_v25 = vrot.slane %v1142_v23, 2 }
 0x420   :  { %v1136_v26 = vrot.slane %v1135_v24, 2 }
 0x421   :  { %v1144_v27 = vadd.f32 %v1143_v25, %v1142_v23 }
 0x422   :  { %v1137_v28 = vadd.f32 %v1136_v26, %v1135_v24 }
 0x423   :  { %v1145_v4 = vrot.slane %v1144_v27, 1 }
 0x424   :  { %v1138_v29 = vrot.slane %v1137_v28, 1 }
 0x425   :  { %v1146_v32 = vadd.f32 %v1145_v4, %v1144_v27  ;;  %v1694_v27 = vld [vmem:[%s2532_s12] ss:$0 sm:$0xff] }
 0x426   :  { %v1139_v5 = vadd.f32 %v1138_v29, %v1137_v28  ;;  %v1126_v33 = vpop.f32.mrb[12].mxu0  ;;  %v1695_v28 = vld [vmem:[%s2533_s13] ss:$0 sm:$0xff]  ;;  %v1368_v4 = vrot.slane %v1694_v27, %v2182_v10 }
 0x427   :  { %2024 = vrcp.f32 %v1126_v33  ;;  %v1863_v34 = vpop.f32.mrb[13].mxu0  ;;  %v1399_v29 = vrot.slane %v1695_v28, %v2182_v10 }
 0x428   :  { %v1149_v35 = vsel %vm874_vm5, %v1146_v32, %v1139_v5  ;;  %v1369_v32 = vcombine.high %v1368_v4, %v1368_v4  ;;  %v1376_v34 = vrot.slane %v1368_v4, %v2182_v10 }
 0x429   :  { %v1151_v36 = vadd.f32 %v1149_v35, %v1130_v21  ;;  %v1528_v21 = vld [vmem:[%s2536_s16 + $0x20] sm:$0xff]  ;;  %v1400_v5 = vcombine.high %v1399_v29, %v1399_v29 }
 0x42a   :  { %v1988_v23 = vpack.c.bf16 %v1529_v22, %v1528_v21  ;;  %v1383_v35 = vrot.slane %v1369_v32, %v2182_v10 }
 0x42b   :  { %v1159_v37 = vmul.f32 %v1690_v56, %v1151_v36 }
 0x431   :  { %v2025_v38 = vpop.eup %2024 }
 0x432   :  { %v1161_v39 = vmul.f32 %v2025_v38, %v1159_v37  ;;  %v1407_v37 = vrot.slane %v1399_v29, %v2182_v10  ;;  %v1414_v38 = vrot.slane %v1400_v5, %v2182_v10 }
 0x434   :  { %1873 = vmatmul.mubr.msk.f32.vlgmr.msra.gmra.mrb[6].mxu1 %vm72_vm0, %v1161_v39 }
 0x435   :  { %1918 = vmatprep.mubr.msk.f32.mxu1 %vm2056_vm2, %v2057_v46  ;;  %1983 = vmatpush3.bf16.msra.mxu1 %v1982_v18 }
 0x436   :  { %1984 = vmatprep.subr.bf16.mxu1 %v2055_v45 }
 0x439   :  { %1986 = vmatpush3.bf16.msra.mxu1 %v1985_v20 }
 0x43a   :  { %1987 = vmatprep.subr.bf16.mxu1 %v2055_v45 }
 0x43d   :  { %1989 = vmatpush3.bf16.msra.mxu1 %v1988_v23 }
 0x43e   :  { %1990 = vmatprep.subr.bf16.mxu1 %v2055_v45 }
 0x507   :  { %v1242_v40 = vpop.f32.mrb[6].mxu1 }
 0x508   :  { %v1243_v41 = vadd.f32 %v1691_v30, %v1242_v40  ;;  %v1874_v42 = vpop.f32.mrb[7].mxu1 }
 0x50a   :  { %v1253_v43 = vmul.f32 %v1693_v31, %v1243_v41 }
 0x50c   :  { %v1261_v44 = vrot.slane %v1253_v43, %v2182_v10 }
 0x50e   :  { %v1262_v47 = vcombine.high %v1261_v44, %v1261_v44  ;;  %v1269_v48 = vrot.slane %v1261_v44, %v2182_v10 }
 0x510   :  { %v1276_v49 = vrot.slane %v1262_v47, %v2182_v10  ;;  %v2392_v46 = vadd.f32 %v1269_v48, %v2169_v0 }
 0x512   :  { %v2395_v50 = vadd.f32 %v1276_v49, %v2174_v1  ;;  %v1532_v49 = vld [vmem:[%s2536_s16 + $0x40] sm:$0xff] }
 0x514   :  { %v1285_v51 = vcombine.low %v2392_v46, %v2395_v50 }
 0x516   :  { %v1292_v52 = vrot.slane %v1285_v51, %v2182_v10  ;;  %v1533_v51 = vld [vmem:[%s2536_s16 + $0x48] sm:$0xff] }
 0x518   :  { %v1299_v53 = vrot.slane %v1292_v52, %v2182_v10  ;;  %v1994_v52 = vpack.c.bf16 %v1533_v51, %v1532_v49 }
 0x51a   :  { %v1301_v54 = vsel %vm134_vm1, %v1299_v53, 0.0  ;;  %v1534_v53 = vld [vmem:[%s2536_s16 + $0x50] sm:$0xff] }
 0x51b   :  { %1302 = vadd.xlane.f32.xlu0 %v1301_v54  ;;  %v1535_v54 = vld [vmem:[%s2536_s16 + $0x58] sm:$0xff] }
 0x5a8   :  { %v1303_v55 = vpop.xlane.xlu0 %1302 }
 0x5a9   :  { %v1304_v57 = vmul.f32 0.03125, %v1303_v55  ;;  %v1997_v55 = vpack.c.bf16 %v1535_v54, %v1534_v53 }
 0x5ab   :  { %v1309_v58 = vrot.slane %v1304_v57, %v2191_v16  ;;  %v1313_v0 = vrot.slane %v1304_v57, %v2193_v17  ;;  %v1536_v57 = vld [vmem:[%s2536_s16 + $0x60] sm:$0xff] }
 0x5ad   :  { %v1316_v59 = vsub.f32 %v2392_v46, %v1309_v58  ;;  %v1317_v1 = vsub.f32 %v2395_v50, %v1313_v0  ;;  %v1537_v58 = vld [vmem:[%s2536_s16 + $0x68] sm:$0xff] }
 0x5ae   :  { %v2000_v0 = vpack.c.bf16 %v1537_v58, %v1536_v57 }
 0x5af   :  { %v1318_v60 = vmul.f32 %v1316_v59, %v1316_v59  ;;  %v1319_v61 = vmul.f32 %v1317_v1, %v1317_v1 }
 0x5b1   :  { %v1322_v62 = vcombine.low %v1318_v60, %v1319_v61  ;;  %v1696_v61 = vld [vmem:[%s2535_s15] ss:$0 sm:$0xff]  ;;  %s2058_s15 = smov [#allocation2]  }
 0x5b2   :  { %s1660_s30 = sshll.u32 %s2058_s15, 4  ;;  %s1661_s30 = int_to_ptr.vmem [resolvable:$true] %s1660_s30 }
 0x5b3   :  { %v1329_v63 = vrot.slane %v1322_v62, %v2182_v10  ;;  %s2030_s17 = scalar_lea.vmem %s1661_s30, 32  ;;  %p2035_p1 = scmp.lt.s32.totalorder %s1661_s30, %s1661_s30 }
 0x5b4   :  { %p2031_p0 = scmp.ne.s32.totalorder %s1661_s30, %s2030_s17  ;;  %p2036_p2 = scmp.lt.s32.totalorder %s2030_s17, %s2030_s17 }
 0x5b5   :  { %v1336_v2 = vrot.slane %v1329_v63, %v2182_v10 }
 0x5b6   :  { %p2037_p3 = por %p2036_p2, %p2035_p1 }
 0x5b7   :  { %v1338_v3 = vsel %vm134_vm1, %v1336_v2, 0.0 }
 0x5b8   :  { %1339 = vadd.xlane.f32.xlu1 %v1338_v3  ;;  %p2038_p4 = pnand %p2037_p3, %p2031_p0 }
 0x645   :  { %v1340_v24 = vpop.xlane.xlu1 %1339 }
 0x646   :  { %v1341_v25 = vmul.f32 0.03125, %v1340_v24 }
 0x648   :  { %v1342_v26 = vadd.f32 1e-05, %v1341_v25 }
 0x64a   :  { %2026 = vrsqrt.f32 %v1342_v26 }
 0x654   :  { %v2027_v33 = vpop.eup %2026 }
 0x655   :  { %v1348_v36 = vrot.slane %v2027_v33, %v2191_v16  ;;  %v1352_v56 = vrot.slane %v2027_v33, %v2193_v17  ;;  %v1530_v16 = vld [vmem:[%s2536_s16 + $0x30] sm:$0xff]  ;;  %v1531_v17 = vld [vmem:[%s2536_s16 + $0x38] sm:$0xff] }
 0x656   :  { %v1991_v48 = vpack.c.bf16 %v1531_v17, %v1530_v16 }
 0x657   :  { %v1355_v39 = vmul.f32 %v1348_v36, %v1316_v59  ;;  %v1356_v30 = vmul.f32 %v1352_v56, %v1317_v1  ;;  %v1538_v59 = vld [vmem:[%s2536_s16 + $0x70] sm:$0xff]  ;;  %v1539_v1 = vld [vmem:[%s2536_s16 + $0x78] sm:$0xff] }
 0x658   :  { %1992 = vmatpush3.bf16.msra.mxu1 %v1991_v48  ;;  %v2003_v60 = vpack.c.bf16 %v1539_v1, %v1538_v59 }
 0x659   :  { %v1386_v40 = vmul.f32 %v1376_v34, %v1355_v39  ;;  %v1387_v31 = vmul.f32 %v1383_v35, %v1356_v30  ;;  %1993 = vmatprep.subr.bf16.mxu1 %v2055_v45 }
 0x65b   :  { %v1417_v41 = vadd.f32 %v1407_v37, %v1386_v40  ;;  %v1418_v42 = vadd.f32 %v1414_v38, %v1387_v31 }
 0x65c   :  { %1995 = vmatpush3.bf16.msra.mxu1 %v1994_v52 }
 0x65d   :  { %v1432_v43 = vcombine.low %v1417_v41, %v1418_v42  ;;  %1996 = vmatprep.subr.bf16.mxu1 %v2055_v45 }
 0x65f   :  { %v1439_v44 = vrot.slane %v1432_v43, %v2182_v10 }
 0x660   :  { %1998 = vmatpush3.bf16.msra.mxu1 %v1997_v55 }
 0x661   :  { %v1446_v47 = vrot.slane %v1439_v44, %v2182_v10  ;;  %1999 = vmatprep.subr.bf16.mxu1 %v2055_v45 }
 0x663   :  { %1884 = vmatmul.mubr.msk.f32.vlgmr.msra.gmra.mrb[14].mxu0 %vm72_vm0, %v1446_v47 }
 0x664   :  { %2001 = vmatpush3.bf16.msra.mxu1 %v2000_v0 }
 0x665   :  { %2002 = vmatprep.subr.bf16.mxu1 %v2055_v45 }
 0x668   :  { %2004 = vmatpush3.bf16.msra.mxu1 %v2003_v60 }
 0x736   :  { %v1515_v62 = vpop.f32.mrb[14].mxu0 }
 0x737   :  { %v1516_v63 = vadd.f32 %v1696_v61, %v1515_v62  ;;  %v1885_v2 = vpop.f32.mrb[15].mxu0 }
 0x739   :  { %v1520_v3 = vmul.f32 0.70710677, %v1516_v63  ;;  %v1519_v6 = vmul.f32 0.5, %v1516_v63 }
 0x73b   :  { %2028 = verf.f32 %v1520_v3 }
 0x745   :  { %v2029_v45 = vpop.eup %2028 }
 0x746   :  { %v1522_v7 = vadd.f32 1.0, %v2029_v45 }
 0x748   :  { %v1523_v8 = vmul.f32 %v1522_v7, %v1519_v6 }
 0x74a   :  { %1919 = vmatmul.mubr.f32.vlgmr.msra.gmra.mrb[8].mxu1 %v1523_v8 }
 0x81d   :  { %v1613_v11 = vpop.f32.mrb[8].mxu1 }
 0x81e   :  { %v1614_v13 = vadd.f32 %v1698_v9, %v1613_v11  ;;  %v1920_v14 = vpop.f32.mrb[9].mxu1 }
 0x820   :  { %v1624_v15 = vmul.f32 %v1699_v12, %v1614_v13 }
 0x822   :  { %v1632_v18 = vrot.slane %v1624_v15, %v2182_v10 }
 0x824   :  { %v1633_v19 = vcombine.high %v1632_v18, %v1632_v18  ;;  %v1640_v20 = vrot.slane %v1632_v18, %v2182_v10 }
 0x826   :  { %v1647_v21 = vrot.slane %v1633_v19, %v2182_v10  ;;  %v1650_v22 = vadd.f32 %v1640_v20, %v2392_v46 }
 0x828   :  { %v1651_v23 = vadd.f32 %v1647_v21, %v2395_v50  ;;  %1653 = vst.msk [vmem:[#allocation2] sm:$0x1] %vm1652_vm6, %v1650_v22 }
 0x82a   :  { %1654 = vst.msk [vmem:[#allocation2 + $0x1] sm:$0x1] %vm1652_vm6, %v1651_v23 }
 0x82b   :  { %2041 = shalt.err (!%p2038_p4)
}
 0x82c   :  { %s2042_s13 = scalar_lea.hbm %s2540_s20, 32 }
 0x82d   :  { %p2043_p5 = scmp.ne.s32.totalorder %s2540_s20, %s2042_s13  ;;  %p2046_p6 = scmp.lt.u32.totalorder %s2042_s13, %s2540_s20 }
 0x82f   :  { %p2048_p7 = pnand %p2046_p6, %p2043_p5 }
 0x831   :  { %2051 = shalt.err (!%p2048_p7)
}
 0x832   :  { %s2059_s21 = smov 16   ;;  %s2060_s1 = smov 1  }
 0x833   :  { %1666 = dma.vmem_to_hbm [thread:$0]  %s1661_s30, 32, %s2540_s20, [#allocation3], %s2059_s21, %s2059_s21, %s2060_s1  }
 0x834   :  { %2052 = dma.done.wait [#allocation3], 32  }
 0x835   :  { %2053 = vsyncadd [#allocation3], 4294967264 }
 0x836   :  { %1670 = vsyncpa [#allocation3], 1 }

</bundles_post_ra>
